<compile_context>
chip_gen: v7x
topology: tpu7x:2x2x1
jax: 0.10.0
libtpu: 0.0.40
codegen_flags: <defaults>
</compile_context>

<pallas_src>
import functools
import math

import jax
import jax.numpy as jnp
from jax.experimental import pallas as pl
from jax.experimental.pallas import tpu as pltpu


# ----------------------------- shared in-kernel math ------------------------

def _layernorm(x, g, b, eps):
    mean = jnp.mean(x, axis=-1, keepdims=True)
    xc = x - mean
    var = jnp.mean(xc * xc, axis=-1, keepdims=True)
    return xc * jax.lax.rsqrt(var + eps) * g + b


def _gelu_tanh(x):
    c = math.sqrt(2.0 / math.pi)
    return 0.5 * x * (1.0 + jnp.tanh(c * (x + 0.044715 * x * x * x)))


def _vmem_limit_bytes(arrays, out_bytes, scratch_bytes=0):
    """Explicit scoped-VMEM budget: double-buffered in/out blocks + scratch +
    margin, floored at the v6e default (32 MiB), capped at v7x per-core VMEM."""
    in_bytes = sum(int(a.size) * a.dtype.itemsize for a in arrays)
    need = 2 * (in_bytes + int(out_bytes)) + int(scratch_bytes) + (2 << 20)
    return int(min(max(need, 32 << 20), 64 << 20))


# ----------------------------- embed kernel ---------------------------------

def _embed_kernel(p_ref, w_ref, pos_ref, o_ref):
    # patch projection; Conv2d bias + CLS token + pos-embed are all folded into
    # pos_ref (row 0 of p_ref is zeros, so row 0 of the output = cls + pos[0]).
    y = jnp.dot(p_ref[...].astype(jnp.bfloat16), w_ref[...],
                preferred_element_type=jnp.float32) + pos_ref[...]
    o_ref[...] = y.astype(o_ref.dtype)


def embed_tokens(patches, w, pos_cls):
    B, S, K = patches.shape
    D = w.shape[1]
    out_bytes = B * S * D * 2  # bf16 residual stream
    return pl.pallas_call(
        _embed_kernel,
        grid=(B,),
        out_shape=jax.ShapeDtypeStruct((B, S, D), jnp.bfloat16),
        in_specs=[pl.BlockSpec((None, S, K), lambda b: (b, 0, 0)),
                  pl.BlockSpec((K, D), lambda b: (0, 0)),
                  pl.BlockSpec((S, D), lambda b: (0, 0))],
        out_specs=pl.BlockSpec((None, S, D), lambda b: (b, 0, 0)),
        compiler_params=pltpu.CompilerParams(
            dimension_semantics=("parallel",),
            vmem_limit_bytes=_vmem_limit_bytes((patches, w, pos_cls), out_bytes)),
    )(patches, w, pos_cls)


# ----------------------------- transformer block ----------------------------

def _vit_block_kernel(x_ref, ln1_g_ref, ln1_b_ref,
                      qkv_w_ref, qkv_b_ref, proj_w_ref, proj_b_ref,
                      ln2_g_ref, ln2_b_ref,
                      fc1_w_ref, fc1_b_ref, fc2_w_ref, fc2_b_ref,
                      o_ref,
                      qkv_s, heads_s, merged_s, *, num_heads, eps):
    """One full pre-norm transformer block for a single batch element."""
    x = x_ref[...].astype(jnp.float32)                    # (S, D) residual, f32 in-kernel
    S, D = x.shape
    Dh = D // num_heads

    # ---------------- attention (pre-norm) ----------------
    h = _layernorm(x, ln1_g_ref[...], ln1_b_ref[...], eps)
    # ONE fused QKV matmul (S,D)@(D,3D); 1/sqrt(Dh) already folded into the
    # Q weight columns and Q bias at parameter prep.
    qkv_s[...] = jnp.dot(h.astype(jnp.bfloat16), qkv_w_ref[...],
                         preferred_element_type=jnp.float32) + qkv_b_ref[...]

    # head split: (S, 3D) -> (3, H, S, Dh) via static slice copies (in-kernel
    # relayout; no activation reshapes/transposes left to chance).
    for j in range(3):
        for hd in range(num_heads):
            lo = j * D + hd * Dh
            heads_s[j, hd, :, :] = qkv_s[:, lo:lo + Dh]
    q = heads_s[0].astype(jnp.bfloat16)                    # (H, S, Dh)
    k = heads_s[1].astype(jnp.bfloat16)
    v = heads_s[2].astype(jnp.bfloat16)

    # batched-over-heads scores / softmax / PV: one batched MXU pass per stage
    # instead of H unrolled per-head matmuls (keeps vreg live ranges bounded).
    att = jnp.einsum("hqd,hkd->hqk", q, k, preferred_element_type=jnp.float32)
    att = att - jnp.max(att, axis=-1, keepdims=True)
    prob = jnp.exp(att)
    prob = prob * pl.reciprocal(jnp.sum(prob, axis=-1, keepdims=True), approx=True)
    ctx = jnp.einsum("hqk,hkd->hqd", prob.astype(jnp.bfloat16), v,
                     preferred_element_type=jnp.float32)   # (H, S, Dh)

    # head merge into one lane-dense (S, D) tile ...
    for hd in range(num_heads):
        merged_s[:, hd * Dh:(hd + 1) * Dh] = ctx[hd]
    # ... so the output projection is ONE full-depth (S,D)@(D,D) matmul with
    # the residual add and bias fused into its epilogue.
    x = x + jnp.dot(merged_s[...].astype(jnp.bfloat16), proj_w_ref[...],
                    preferred_element_type=jnp.float32) + proj_b_ref[...]

    # ---------------- MLP (pre-norm) ----------------
    h = _layernorm(x, ln2_g_ref[...], ln2_b_ref[...], eps)
    h = jnp.dot(h.astype(jnp.bfloat16), fc1_w_ref[...],
                preferred_element_type=jnp.float32) + fc1_b_ref[...]
    h = _gelu_tanh(h)
    h = jnp.dot(h.astype(jnp.bfloat16), fc2_w_ref[...],
                preferred_element_type=jnp.float32) + fc2_b_ref[...]
    o_ref[...] = (x + h).astype(o_ref.dtype)               # bf16 residual stream


def _resident_spec(arr):
    """Full-array block; same block index every grid step -> stays resident."""
    zeros = (0,) * arr.ndim
    return pl.BlockSpec(arr.shape, lambda b, _z=zeros: _z)


def vit_block(x, blk, *, num_heads, eps=1e-6):
    """Apply one fused transformer block. x: (B, S, D) bf16 -> (B, S, D) bf16."""
    B, S, D = x.shape
    Dh = D // num_heads
    kern = functools.partial(_vit_block_kernel, num_heads=num_heads, eps=eps)
    tok_spec = pl.BlockSpec((None, S, D), lambda b: (b, 0, 0))

    inputs = (
        x,
        blk["ln1_g"], blk["ln1_b"],
        blk["qkv_w"], blk["qkv_b"], blk["proj_w"], blk["proj_b"],
        blk["ln2_g"], blk["ln2_b"],
        blk["fc1_w"], blk["fc1_b"], blk["fc2_w"], blk["fc2_b"],
    )
    in_specs = [tok_spec] + [_resident_spec(a) for a in inputs[1:]]
    scratch = [
        pltpu.VMEM((S, 3 * D), jnp.float32),               # fused QKV output
        pltpu.VMEM((3, num_heads, S, Dh), jnp.float32),    # per-head Q/K/V views
        pltpu.VMEM((S, D), jnp.float32),                   # merged head outputs
    ]
    scratch_bytes = 4 * (S * 3 * D + 3 * num_heads * S * Dh + S * D)
    out_bytes = B * S * D * x.dtype.itemsize
    return pl.pallas_call(
        kern,
        grid=(B,),
        out_shape=jax.ShapeDtypeStruct((B, S, D), x.dtype),
        in_specs=in_specs,
        out_specs=tok_spec,
        scratch_shapes=scratch,
        compiler_params=pltpu.CompilerParams(
            # megacore batch split on v7x; near-no-op (serial 2-step loop) on v5e/v6e.
            dimension_semantics=("parallel",),
            vmem_limit_bytes=_vmem_limit_bytes(inputs, out_bytes, scratch_bytes)),
    )(*inputs)


# ----------------------------- final LN + CLS head --------------------------

def _head_kernel(x_ref, g_ref, b_ref, w_ref, o_ref, *, eps):
    xn = _layernorm(x_ref[...].astype(jnp.float32), g_ref[...], b_ref[...], eps)
    o_ref[...] = jnp.dot(xn.astype(jnp.bfloat16), w_ref[...],
                         preferred_element_type=jnp.float32)


def cls_head(cls_tokens, g, b, proj_w, eps=1e-6):
    B, D = cls_tokens.shape
    F = proj_w.shape[1]
    kern = functools.partial(_head_kernel, eps=eps)
    out_bytes = B * F * 4
    return pl.pallas_call(
        kern,
        out_shape=jax.ShapeDtypeStruct((B, F), jnp.float32),
        in_specs=[pl.BlockSpec((B, D), lambda: (0, 0)),
                  pl.BlockSpec((1, D), lambda: (0, 0)),
                  pl.BlockSpec((1, D), lambda: (0, 0)),
                  pl.BlockSpec((D, F), lambda: (0, 0))],
        out_specs=pl.BlockSpec((B, F), lambda: (0, 0)),
        compiler_params=pltpu.CompilerParams(
            vmem_limit_bytes=_vmem_limit_bytes((cls_tokens, g, b, proj_w), out_bytes)),
    )(cls_tokens, g, b, proj_w)


# ----------------------------- model (glue) ---------------------------------

def init_params(key, cfg, in_ch, img):
    P, D, L = cfg["patch"], cfg["dim"], cfg["layers"]
    MLP, F, H = cfg["mlp"], cfg["feat"], cfg["heads"]
    Dh = D // H
    Np = (img // P) ** 2
    S = Np + 1

    def normal(k, shape, std=0.02):
        return std * jax.random.normal(k, shape, jnp.float32)

    keys = list(jax.random.split(key, 4 + 4 * L))
    it = iter(keys)
    params = dict(
        # Conv2d(C, D, kernel=stride=P) weight flattened to (C*P*P, D); bf16.
        patch_w=normal(next(it), (in_ch * P * P, D)).astype(jnp.bfloat16),
        patch_b=jnp.zeros((1, D), jnp.float32),
        cls_token=normal(next(it), (1, 1, D)),
        pos_embed=normal(next(it), (1, S, D)),
        lnf_g=jnp.ones((1, D), jnp.float32),
        lnf_b=jnp.zeros((1, D), jnp.float32),
        proj_w=normal(next(it), (D, F)).astype(jnp.bfloat16),  # open_clip head (no bias)
        blocks=[],
    )
    scale = Dh ** -0.5
    for _ in range(L):
        # timm-style (D, 3D) qkv layout: output columns [Q | K | V], heads
        # contiguous inside each D.  The 1/sqrt(Dh) attention scale is folded
        # into the Q columns and Q bias so the kernel never scales the scores.
        # (Real checkpoints would need the (out,in)->(in,out) transpose here.)
        qkv_w = normal(next(it), (D, 3 * D))
        qkv_w = qkv_w.at[:, :D].multiply(scale)
        qkv_b = jnp.zeros((1, 3 * D), jnp.float32)
        qkv_b = qkv_b.at[:, :D].multiply(scale)
        params["blocks"].append(dict(
            ln1_g=jnp.ones((1, D), jnp.float32), ln1_b=jnp.zeros((1, D), jnp.float32),
            qkv_w=qkv_w.astype(jnp.bfloat16),
            qkv_b=qkv_b,
            proj_w=normal(next(it), (D, D)).astype(jnp.bfloat16),
            proj_b=jnp.zeros((1, D), jnp.float32),
            ln2_g=jnp.ones((1, D), jnp.float32), ln2_b=jnp.zeros((1, D), jnp.float32),
            fc1_w=normal(next(it), (D, MLP)).astype(jnp.bfloat16),
            fc1_b=jnp.zeros((1, MLP), jnp.float32),
            fc2_w=normal(next(it), (MLP, D)).astype(jnp.bfloat16),
            fc2_b=jnp.zeros((1, D), jnp.float32),
        ))
    return params


def vit_forward(images, params, cfg):
    B, C, Himg, Wimg = images.shape
    P, D, nH = cfg["patch"], cfg["dim"], cfg["heads"]
    nh, nw = Himg // P, Wimg // P
    Np = nh * nw

    # NCHW -> non-overlapping PxP patches, flattened in the (C, ph, pw) order of
    # a PyTorch Conv2d(kernel=stride=P) weight flatten.  Row 0 is a zero "CLS
    # slot" so the embed kernel's epilogue add produces the CLS token.
    # TODO(synk): at real image sizes fold this gather into the embed kernel's
    # BlockSpec index_map (grid over patches reading straight from NCHW HBM).
    patches = images.reshape(B, C, nh, P, nw, P)
    patches = patches.transpose(0, 2, 4, 1, 3, 5).reshape(B, Np, C * P * P)
    patches = jnp.pad(patches, ((0, 0), (1, 0), (0, 0)))          # (B, S, C*P*P)

    # parameter-only prep (tiny, constant-foldable): pos-embed + Conv2d bias for
    # patch rows; CLS token + pos-embed (no conv bias) for row 0.
    pos = params["pos_embed"][0]                                  # (S, D)
    pos_cls = pos + params["patch_b"]
    pos_cls = pos_cls.at[0].set(params["cls_token"][0, 0] + pos[0])

    x = embed_tokens(patches, params["patch_w"], pos_cls)         # (B, S, D) bf16

    for blk in params["blocks"]:
        x = vit_block(x, blk, num_heads=nH)

    # final LayerNorm is per-token, so LN(x)[:, 0] == LN(x[:, 0]): run the fused
    # LN + CLS-pool + projection head on the CLS rows only.
    feats = cls_head(x[:, 0], params["lnf_g"], params["lnf_b"], params["proj_w"])
    return feats                                                  # (B, feat) f32


# ------------------------------- main ----------------------------------------

if __name__ == "__main__":
    cfg = dict(patch=8, dim=64, heads=4, layers=2, mlp=256, feat=32)
    key = jax.random.PRNGKey(0)
    k_img, k_par = jax.random.split(key)

    images = jax.random.normal(k_img, (2, 3, 32, 32), jnp.float32)  # NCHW
    params = init_params(k_par, cfg, in_ch=3, img=32)

    fwd = jax.jit(lambda imgs, p: vit_forward(imgs, p, cfg))
    out = fwd(images, params)
    jax.block_until_ready(out)
    assert out.shape == (2, cfg["feat"]), out.shape
    assert bool(jnp.all(jnp.isfinite(out)))
    print("KERNEL_OK")
</pallas_src>

<mosaic_0001>
module attributes {stable_mosaic.version = 11 : i64} {
  func.func @_embed_kernel(%arg0: i32, %arg1: memref<1x17x192xf32, #tpu.memory_space<vmem>>, %arg2: memref<192x64xbf16, #tpu.memory_space<vmem>>, %arg3: memref<17x64xf32, #tpu.memory_space<vmem>>, %arg4: memref<1x17x64xbf16, #tpu.memory_space<vmem>>) attributes {dimension_semantics = [#tpu.dimension_semantics<parallel>], iteration_bounds = array<i64: 2>, scalar_prefetch = 0 : i64, scratch_operands = 0 : i64, tpu.core_type = #tpu.core_type<tc>, window_params = [{transform_indices = @transform_0, window_bounds = array<i64: 1, 17, 192>}, {pipeline_mode = #tpu.pipeline_mode<synchronous>, transform_indices = @transform_1, window_bounds = array<i64: 192, 64>}, {pipeline_mode = #tpu.pipeline_mode<synchronous>, transform_indices = @transform_2, window_bounds = array<i64: 17, 64>}, {transform_indices = @transform_3, window_bounds = array<i64: 1, 17, 64>}]} {
    %c0 = arith.constant 0 : index
    %c0_0 = arith.constant 0 : index
    %c0_1 = arith.constant 0 : index
    %0 = vector.load %arg1[%c0, %c0_0, %c0_1] : memref<1x17x192xf32, #tpu.memory_space<vmem>>, vector<1x17x192xf32>
    %1 = vector.shape_cast %0 : vector<1x17x192xf32> to vector<17x192xf32>
    %2 = arith.truncf %1 : vector<17x192xf32> to vector<17x192xbf16>
    %c0_2 = arith.constant 0 : index
    %c0_3 = arith.constant 0 : index
    %3 = vector.load %arg2[%c0_2, %c0_3] : memref<192x64xbf16, #tpu.memory_space<vmem>>, vector<192x64xbf16>
    %cst = arith.constant dense<0.000000e+00> : vector<17x64xf32>
    %4 = tpu.matmul %2, %3, %cst {dimension_numbers = #tpu.dot_dimension_numbers<[1], [0], [0], [1], [0, 0, 1, 1], [], []>} : vector<17x192xbf16>, vector<192x64xbf16>, vector<17x64xf32> -> vector<17x64xf32>
    %c0_4 = arith.constant 0 : index
    %c0_5 = arith.constant 0 : index
    %5 = vector.load %arg3[%c0_4, %c0_5] : memref<17x64xf32, #tpu.memory_space<vmem>>, vector<17x64xf32>
    %6 = arith.addf %4, %5 : vector<17x64xf32>
    %7 = arith.truncf %6 : vector<17x64xf32> to vector<17x64xbf16>
    %c0_6 = arith.constant 0 : index
    %c0_7 = arith.constant 0 : index
    %c0_8 = arith.constant 0 : index
    %8 = vector.load %arg4[%c0_6, %c0_7, %c0_8] : memref<1x17x64xbf16, #tpu.memory_space<vmem>>, vector<1x17x64xbf16>
    %9 = vector.shape_cast %8 : vector<1x17x64xbf16> to vector<17x64xbf16>
    %10 = vector.shape_cast %7 : vector<17x64xbf16> to vector<1x17x64xbf16>
    tpu.vector_store %arg4[%c0_6, %c0_7, %c0_8], %10 {strides = array<i32>} : memref<1x17x64xbf16, #tpu.memory_space<vmem>>, vector<1x17x64xbf16>,
    return
  }
  func.func @transform_0(%arg0: i32) -> (i32, i32, i32) {
    %c0_i32 = arith.constant 0 : i32
    %c0_i32_0 = arith.constant 0 : i32
    %c0_i32_1 = arith.constant 0 : i32
    return %arg0, %c0_i32, %c0_i32_0 : i32, i32, i32
  }
  func.func @transform_1(%arg0: i32) -> (i32, i32) {
    %c0_i32 = arith.constant 0 : i32
    %c0_i32_0 = arith.constant 0 : i32
    %c0_i32_1 = arith.constant 0 : i32
    return %c0_i32, %c0_i32_0 : i32, i32
  }
  func.func @transform_2(%arg0: i32) -> (i32, i32) {
    %c0_i32 = arith.constant 0 : i32
    %c0_i32_0 = arith.constant 0 : i32
    %c0_i32_1 = arith.constant 0 : i32
    return %c0_i32, %c0_i32_0 : i32, i32
  }
  func.func @transform_3(%arg0: i32) -> (i32, i32, i32) {
    %c0_i32 = arith.constant 0 : i32
    %c0_i32_0 = arith.constant 0 : i32
    %c0_i32_1 = arith.constant 0 : i32
    return %arg0, %c0_i32, %c0_i32_0 : i32, i32, i32
  }
}

module attributes {stable_mosaic.version = 11 : i64} {
  func.func @_head_kernel(%arg0: memref<2x64xbf16, #tpu.memory_space<vmem>>, %arg1: memref<1x64xf32, #tpu.memory_space<vmem>>, %arg2: memref<1x64xf32, #tpu.memory_space<vmem>>, %arg3: memref<64x32xbf16, #tpu.memory_space<vmem>>, %arg4: memref<2x32xf32, #tpu.memory_space<vmem>>) attributes {dimension_semantics = [], scalar_prefetch = 0 : i64, scratch_operands = 0 : i64, tpu.core_type = #tpu.core_type<tc>} {
    %c0 = arith.constant 0 : index
    %c0_0 = arith.constant 0 : index
    %0 = vector.load %arg0[%c0, %c0_0] : memref<2x64xbf16, #tpu.memory_space<vmem>>, vector<2x64xbf16>
    %1 = arith.extf %0 : vector<2x64xbf16> to vector<2x64xf32>
    %c0_1 = arith.constant 0 : index
    %c0_2 = arith.constant 0 : index
    %2 = vector.load %arg1[%c0_1, %c0_2] : memref<1x64xf32, #tpu.memory_space<vmem>>, vector<1x64xf32>
    %c0_3 = arith.constant 0 : index
    %c0_4 = arith.constant 0 : index
    %3 = vector.load %arg2[%c0_3, %c0_4] : memref<1x64xf32, #tpu.memory_space<vmem>>, vector<1x64xf32>
    %cst = arith.constant dense<0.000000e+00> : vector<2xf32>
    %4 = vector.multi_reduction <add>, %1, %cst [1] : vector<2x64xf32> to vector<2xf32>
    %5 = vector.shape_cast %4 : vector<2xf32> to vector<2x1xf32>
    %cst_5 = arith.constant 6.400000e+01 : f32
    %6 = vector.broadcast %cst_5 : f32 to vector<2x1xf32>
    %7 = arith.divf %5, %6 : vector<2x1xf32>
    %8 = vector.broadcast %7 : vector<2x1xf32> to vector<2x64xf32>
    %9 = arith.subf %1, %8 : vector<2x64xf32>
    %10 = arith.mulf %9, %9 : vector<2x64xf32>
    %cst_6 = arith.constant dense<0.000000e+00> : vector<2xf32>
    %11 = vector.multi_reduction <add>, %10, %cst_6 [1] : vector<2x64xf32> to vector<2xf32>
    %12 = vector.shape_cast %11 : vector<2xf32> to vector<2x1xf32>
    %cst_7 = arith.constant 6.400000e+01 : f32
    %13 = vector.broadcast %cst_7 : f32 to vector<2x1xf32>
    %14 = arith.divf %12, %13 : vector<2x1xf32>
    %cst_8 = arith.constant 9.99999997E-7 : f32
    %15 = vector.broadcast %cst_8 : f32 to vector<2x1xf32>
    %16 = arith.addf %14, %15 : vector<2x1xf32>
    %17 = math.rsqrt %16 : vector<2x1xf32>
    %18 = vector.broadcast %17 : vector<2x1xf32> to vector<2x64xf32>
    %19 = arith.mulf %9, %18 : vector<2x64xf32>
    %20 = vector.broadcast %2 : vector<1x64xf32> to vector<2x64xf32>
    %21 = arith.mulf %19, %20 : vector<2x64xf32>
    %22 = vector.broadcast %3 : vector<1x64xf32> to vector<2x64xf32>
    %23 = arith.addf %21, %22 : vector<2x64xf32>
    %24 = arith.truncf %23 : vector<2x64xf32> to vector<2x64xbf16>
    %c0_9 = arith.constant 0 : index
    %c0_10 = arith.constant 0 : index
    %25 = vector.load %arg3[%c0_9, %c0_10] : memref<64x32xbf16, #tpu.memory_space<vmem>>, vector<64x32xbf16>
    %cst_11 = arith.constant dense<0.000000e+00> : vector<2x32xf32>
    %26 = tpu.matmul %24, %25, %cst_11 {dimension_numbers = #tpu.dot_dimension_numbers<[1], [0], [0], [1], [0, 0, 1, 1], [], []>} : vector<2x64xbf16>, vector<64x32xbf16>, vector<2x32xf32> -> vector<2x32xf32>
    %c0_12 = arith.constant 0 : index
    %c0_13 = arith.constant 0 : index
    %27 = vector.load %arg4[%c0_12, %c0_13] : memref<2x32xf32, #tpu.memory_space<vmem>>, vector<2x32xf32>
    tpu.vector_store %arg4[%c0_12, %c0_13], %26 {strides = array<i32>} : memref<2x32xf32, #tpu.memory_space<vmem>>, vector<2x32xf32>,
    return
  }
}

module attributes {stable_mosaic.version = 11 : i64} {
  func.func @_vit_block_kernel(%arg0: i32, %arg1: memref<1x17x64xbf16, #tpu.memory_space<vmem>>, %arg2: memref<1x64xf32, #tpu.memory_space<vmem>>, %arg3: memref<1x64xf32, #tpu.memory_space<vmem>>, %arg4: memref<64x192xbf16, #tpu.memory_space<vmem>>, %arg5: memref<1x192xf32, #tpu.memory_space<vmem>>, %arg6: memref<64x64xbf16, #tpu.memory_space<vmem>>, %arg7: memref<1x64xf32, #tpu.memory_space<vmem>>, %arg8: memref<1x64xf32, #tpu.memory_space<vmem>>, %arg9: memref<1x64xf32, #tpu.memory_space<vmem>>, %arg10: memref<64x256xbf16, #tpu.memory_space<vmem>>, %arg11: memref<1x256xf32, #tpu.memory_space<vmem>>, %arg12: memref<256x64xbf16, #tpu.memory_space<vmem>>, %arg13: memref<1x64xf32, #tpu.memory_space<vmem>>, %arg14: memref<1x17x64xbf16, #tpu.memory_space<vmem>>, %arg15: memref<17x192xf32, #tpu.memory_space<vmem>>, %arg16: memref<3x4x17x16xf32, #tpu.memory_space<vmem>>, %arg17: memref<17x64xf32, #tpu.memory_space<vmem>>) attributes {dimension_semantics = [#tpu.dimension_semantics<parallel>], iteration_bounds = array<i64: 2>, scalar_prefetch = 0 : i64, scratch_operands = 3 : i64, tpu.core_type = #tpu.core_type<tc>, window_params = [{transform_indices = @transform_0, window_bounds = array<i64: 1, 17, 64>}, {pipeline_mode = #tpu.pipeline_mode<synchronous>, transform_indices = @transform_1, window_bounds = array<i64: 1, 64>}, {pipeline_mode = #tpu.pipeline_mode<synchronous>, transform_indices = @transform_2, window_bounds = array<i64: 1, 64>}, {pipeline_mode = #tpu.pipeline_mode<synchronous>, transform_indices = @transform_3, window_bounds = array<i64: 64, 192>}, {pipeline_mode = #tpu.pipeline_mode<synchronous>, transform_indices = @transform_4, window_bounds = array<i64: 1, 192>}, {pipeline_mode = #tpu.pipeline_mode<synchronous>, transform_indices = @transform_5, window_bounds = array<i64: 64, 64>}, {pipeline_mode = #tpu.pipeline_mode<synchronous>, transform_indices = @transform_6, window_bounds = array<i64: 1, 64>}, {pipeline_mode = #tpu.pipeline_mode<synchronous>, transform_indices = @transform_7, window_bounds = array<i64: 1, 64>}, {pipeline_mode = #tpu.pipeline_mode<synchronous>, transform_indices = @transform_8, window_bounds = array<i64: 1, 64>}, {pipeline_mode = #tpu.pipeline_mode<synchronous>, transform_indices = @transform_9, window_bounds = array<i64: 64, 256>}, {pipeline_mode = #tpu.pipeline_mode<synchronous>, transform_indices = @transform_10, window_bounds = array<i64: 1, 256>}, {pipeline_mode = #tpu.pipeline_mode<synchronous>, transform_indices = @transform_11, window_bounds = array<i64: 256, 64>}, {pipeline_mode = #tpu.pipeline_mode<synchronous>, transform_indices = @transform_12, window_bounds = array<i64: 1, 64>}, {transform_indices = @transform_13, window_bounds = array<i64: 1, 17, 64>}]} {
    %c0 = arith.constant 0 : index
    %c0_0 = arith.constant 0 : index
    %c0_1 = arith.constant 0 : index
    %0 = vector.load %arg1[%c0, %c0_0, %c0_1] : memref<1x17x64xbf16, #tpu.memory_space<vmem>>, vector<1x17x64xbf16>
    %1 = vector.shape_cast %0 : vector<1x17x64xbf16> to vector<17x64xbf16>
    %2 = arith.extf %1 : vector<17x64xbf16> to vector<17x64xf32>
    %c0_2 = arith.constant 0 : index
    %c0_3 = arith.constant 0 : index
    %3 = vector.load %arg2[%c0_2, %c0_3] : memref<1x64xf32, #tpu.memory_space<vmem>>, vector<1x64xf32>
    %c0_4 = arith.constant 0 : index
    %c0_5 = arith.constant 0 : index
    %4 = vector.load %arg3[%c0_4, %c0_5] : memref<1x64xf32, #tpu.memory_space<vmem>>, vector<1x64xf32>
    %cst = arith.constant dense<0.000000e+00> : vector<17xf32>
    %5 = vector.multi_reduction <add>, %2, %cst [1] : vector<17x64xf32> to vector<17xf32>
    %6 = vector.shape_cast %5 : vector<17xf32> to vector<17x1xf32>
    %cst_6 = arith.constant 6.400000e+01 : f32
    %7 = vector.broadcast %cst_6 : f32 to vector<17x1xf32>
    %8 = arith.divf %6, %7 : vector<17x1xf32>
    %9 = vector.broadcast %8 : vector<17x1xf32> to vector<17x64xf32>
    %10 = arith.subf %2, %9 : vector<17x64xf32>
    %11 = arith.mulf %10, %10 : vector<17x64xf32>
    %cst_7 = arith.constant dense<0.000000e+00> : vector<17xf32>
    %12 = vector.multi_reduction <add>, %11, %cst_7 [1] : vector<17x64xf32> to vector<17xf32>
    %13 = vector.shape_cast %12 : vector<17xf32> to vector<17x1xf32>
    %cst_8 = arith.constant 6.400000e+01 : f32
    %14 = vector.broadcast %cst_8 : f32 to vector<17x1xf32>
    %15 = arith.divf %13, %14 : vector<17x1xf32>
    %cst_9 = arith.constant 9.99999997E-7 : f32
    %16 = vector.broadcast %cst_9 : f32 to vector<17x1xf32>
    %17 = arith.addf %15, %16 : vector<17x1xf32>
    %18 = math.rsqrt %17 : vector<17x1xf32>
    %19 = vector.broadcast %18 : vector<17x1xf32> to vector<17x64xf32>
    %20 = arith.mulf %10, %19 : vector<17x64xf32>
    %21 = vector.broadcast %3 : vector<1x64xf32> to vector<17x64xf32>
    %22 = arith.mulf %20, %21 : vector<17x64xf32>
    %23 = vector.broadcast %4 : vector<1x64xf32> to vector<17x64xf32>
    %24 = arith.addf %22, %23 : vector<17x64xf32>
    %25 = arith.truncf %24 : vector<17x64xf32> to vector<17x64xbf16>
    %c0_10 = arith.constant 0 : index
    %c0_11 = arith.constant 0 : index
    %26 = vector.load %arg4[%c0_10, %c0_11] : memref<64x192xbf16, #tpu.memory_space<vmem>>, vector<64x192xbf16>
    %cst_12 = arith.constant dense<0.000000e+00> : vector<17x192xf32>
    %27 = tpu.matmul %25, %26, %cst_12 {dimension_numbers = #tpu.dot_dimension_numbers<[1], [0], [0], [1], [0, 0, 1, 1], [], []>} : vector<17x64xbf16>, vector<64x192xbf16>, vector<17x192xf32> -> vector<17x192xf32>
    %c0_13 = arith.constant 0 : index
    %c0_14 = arith.constant 0 : index
    %28 = vector.load %arg5[%c0_13, %c0_14] : memref<1x192xf32, #tpu.memory_space<vmem>>, vector<1x192xf32>
    %29 = vector.broadcast %28 : vector<1x192xf32> to vector<17x192xf32>
    %30 = arith.addf %27, %29 : vector<17x192xf32>
    %c0_15 = arith.constant 0 : index
    %c0_16 = arith.constant 0 : index
    %31 = vector.load %arg15[%c0_15, %c0_16] : memref<17x192xf32, #tpu.memory_space<vmem>>, vector<17x192xf32>
    tpu.vector_store %arg15[%c0_15, %c0_16], %30 {strides = array<i32>} : memref<17x192xf32, #tpu.memory_space<vmem>>, vector<17x192xf32>,
    %c0_17 = arith.constant 0 : index
    %c0_18 = arith.constant 0 : index
    %32 = vector.load %arg15[%c0_17, %c0_18] : memref<17x192xf32, #tpu.memory_space<vmem>>, vector<17x16xf32>
    %c0_19 = arith.constant 0 : index
    %c0_20 = arith.constant 0 : index
    %c0_21 = arith.constant 0 : index
    %c0_22 = arith.constant 0 : index
    %33 = vector.load %arg16[%c0_19, %c0_20, %c0_21, %c0_22] : memref<3x4x17x16xf32, #tpu.memory_space<vmem>>, vector<1x1x17x16xf32>
    %34 = vector.shape_cast %33 : vector<1x1x17x16xf32> to vector<17x16xf32>
    %35 = vector.shape_cast %32 : vector<17x16xf32> to vector<1x1x17x16xf32>
    tpu.vector_store %arg16[%c0_19, %c0_20, %c0_21, %c0_22], %35 {strides = array<i32>} : memref<3x4x17x16xf32, #tpu.memory_space<vmem>>, vector<1x1x17x16xf32>,
    %c0_23 = arith.constant 0 : index
    %c16 = arith.constant 16 : index
    %36 = vector.load %arg15[%c0_23, %c16] : memref<17x192xf32, #tpu.memory_space<vmem>>, vector<17x16xf32>
    %c0_24 = arith.constant 0 : index
    %c1 = arith.constant 1 : index
    %c0_25 = arith.constant 0 : index
    %c0_26 = arith.constant 0 : index
    %37 = vector.load %arg16[%c0_24, %c1, %c0_25, %c0_26] : memref<3x4x17x16xf32, #tpu.memory_space<vmem>>, vector<1x1x17x16xf32>
    %38 = vector.shape_cast %37 : vector<1x1x17x16xf32> to vector<17x16xf32>
    %39 = vector.shape_cast %36 : vector<17x16xf32> to vector<1x1x17x16xf32>
    tpu.vector_store %arg16[%c0_24, %c1, %c0_25, %c0_26], %39 {strides = array<i32>} : memref<3x4x17x16xf32, #tpu.memory_space<vmem>>, vector<1x1x17x16xf32>,
    %c0_27 = arith.constant 0 : index
    %c32 = arith.constant 32 : index
    %40 = vector.load %arg15[%c0_27, %c32] : memref<17x192xf32, #tpu.memory_space<vmem>>, vector<17x16xf32>
    %c0_28 = arith.constant 0 : index
    %c2 = arith.constant 2 : index
    %c0_29 = arith.constant 0 : index
    %c0_30 = arith.constant 0 : index
    %41 = vector.load %arg16[%c0_28, %c2, %c0_29, %c0_30] : memref<3x4x17x16xf32, #tpu.memory_space<vmem>>, vector<1x1x17x16xf32>
    %42 = vector.shape_cast %41 : vector<1x1x17x16xf32> to vector<17x16xf32>
    %43 = vector.shape_cast %40 : vector<17x16xf32> to vector<1x1x17x16xf32>
    tpu.vector_store %arg16[%c0_28, %c2, %c0_29, %c0_30], %43 {strides = array<i32>} : memref<3x4x17x16xf32, #tpu.memory_space<vmem>>, vector<1x1x17x16xf32>,
    %c0_31 = arith.constant 0 : index
    %c48 = arith.constant 48 : index
    %44 = vector.load %arg15[%c0_31, %c48] : memref<17x192xf32, #tpu.memory_space<vmem>>, vector<17x16xf32>
    %c0_32 = arith.constant 0 : index
    %c3 = arith.constant 3 : index
    %c0_33 = arith.constant 0 : index
    %c0_34 = arith.constant 0 : index
    %45 = vector.load %arg16[%c0_32, %c3, %c0_33, %c0_34] : memref<3x4x17x16xf32, #tpu.memory_space<vmem>>, vector<1x1x17x16xf32>
    %46 = vector.shape_cast %45 : vector<1x1x17x16xf32> to vector<17x16xf32>
    %47 = vector.shape_cast %44 : vector<17x16xf32> to vector<1x1x17x16xf32>
    tpu.vector_store %arg16[%c0_32, %c3, %c0_33, %c0_34], %47 {strides = array<i32>} : memref<3x4x17x16xf32, #tpu.memory_space<vmem>>, vector<1x1x17x16xf32>,
    %c0_35 = arith.constant 0 : index
    %c64 = arith.constant 64 : index
    %48 = vector.load %arg15[%c0_35, %c64] : memref<17x192xf32, #tpu.memory_space<vmem>>, vector<17x16xf32>
    %c1_36 = arith.constant 1 : index
    %c0_37 = arith.constant 0 : index
    %c0_38 = arith.constant 0 : index
    %c0_39 = arith.constant 0 : index
    %49 = vector.load %arg16[%c1_36, %c0_37, %c0_38, %c0_39] : memref<3x4x17x16xf32, #tpu.memory_space<vmem>>, vector<1x1x17x16xf32>
    %50 = vector.shape_cast %49 : vector<1x1x17x16xf32> to vector<17x16xf32>
    %51 = vector.shape_cast %48 : vector<17x16xf32> to vector<1x1x17x16xf32>
    tpu.vector_store %arg16[%c1_36, %c0_37, %c0_38, %c0_39], %51 {strides = array<i32>} : memref<3x4x17x16xf32, #tpu.memory_space<vmem>>, vector<1x1x17x16xf32>,
    %c0_40 = arith.constant 0 : index
    %c80 = arith.constant 80 : index
    %52 = vector.load %arg15[%c0_40, %c80] : memref<17x192xf32, #tpu.memory_space<vmem>>, vector<17x16xf32>
    %c1_41 = arith.constant 1 : index
    %c1_42 = arith.constant 1 : index
    %c0_43 = arith.constant 0 : index
    %c0_44 = arith.constant 0 : index
    %53 = vector.load %arg16[%c1_41, %c1_42, %c0_43, %c0_44] : memref<3x4x17x16xf32, #tpu.memory_space<vmem>>, vector<1x1x17x16xf32>
    %54 = vector.shape_cast %53 : vector<1x1x17x16xf32> to vector<17x16xf32>
    %55 = vector.shape_cast %52 : vector<17x16xf32> to vector<1x1x17x16xf32>
    tpu.vector_store %arg16[%c1_41, %c1_42, %c0_43, %c0_44], %55 {strides = array<i32>} : memref<3x4x17x16xf32, #tpu.memory_space<vmem>>, vector<1x1x17x16xf32>,
    %c0_45 = arith.constant 0 : index
    %c96 = arith.constant 96 : index
    %56 = vector.load %arg15[%c0_45, %c96] : memref<17x192xf32, #tpu.memory_space<vmem>>, vector<17x16xf32>
    %c1_46 = arith.constant 1 : index
    %c2_47 = arith.constant 2 : index
    %c0_48 = arith.constant 0 : index
    %c0_49 = arith.constant 0 : index
    %57 = vector.load %arg16[%c1_46, %c2_47, %c0_48, %c0_49] : memref<3x4x17x16xf32, #tpu.memory_space<vmem>>, vector<1x1x17x16xf32>
    %58 = vector.shape_cast %57 : vector<1x1x17x16xf32> to vector<17x16xf32>
    %59 = vector.shape_cast %56 : vector<17x16xf32> to vector<1x1x17x16xf32>
    tpu.vector_store %arg16[%c1_46, %c2_47, %c0_48, %c0_49], %59 {strides = array<i32>} : memref<3x4x17x16xf32, #tpu.memory_space<vmem>>, vector<1x1x17x16xf32>,
    %c0_50 = arith.constant 0 : index
    %c112 = arith.constant 112 : index
    %60 = vector.load %arg15[%c0_50, %c112] : memref<17x192xf32, #tpu.memory_space<vmem>>, vector<17x16xf32>
    %c1_51 = arith.constant 1 : index
    %c3_52 = arith.constant 3 : index
    %c0_53 = arith.constant 0 : index
    %c0_54 = arith.constant 0 : index
    %61 = vector.load %arg16[%c1_51, %c3_52, %c0_53, %c0_54] : memref<3x4x17x16xf32, #tpu.memory_space<vmem>>, vector<1x1x17x16xf32>
    %62 = vector.shape_cast %61 : vector<1x1x17x16xf32> to vector<17x16xf32>
    %63 = vector.shape_cast %60 : vector<17x16xf32> to vector<1x1x17x16xf32>
    tpu.vector_store %arg16[%c1_51, %c3_52, %c0_53, %c0_54], %63 {strides = array<i32>} : memref<3x4x17x16xf32, #tpu.memory_space<vmem>>, vector<1x1x17x16xf32>,
    %c0_55 = arith.constant 0 : index
    %c128 = arith.constant 128 : index
    %64 = vector.load %arg15[%c0_55, %c128] : memref<17x192xf32, #tpu.memory_space<vmem>>, vector<17x16xf32>
    %c2_56 = arith.constant 2 : index
    %c0_57 = arith.constant 0 : index
    %c0_58 = arith.constant 0 : index
    %c0_59 = arith.constant 0 : index
    %65 = vector.load %arg16[%c2_56, %c0_57, %c0_58, %c0_59] : memref<3x4x17x16xf32, #tpu.memory_space<vmem>>, vector<1x1x17x16xf32>
    %66 = vector.shape_cast %65 : vector<1x1x17x16xf32> to vector<17x16xf32>
    %67 = vector.shape_cast %64 : vector<17x16xf32> to vector<1x1x17x16xf32>
    tpu.vector_store %arg16[%c2_56, %c0_57, %c0_58, %c0_59], %67 {strides = array<i32>} : memref<3x4x17x16xf32, #tpu.memory_space<vmem>>, vector<1x1x17x16xf32>,
    %c0_60 = arith.constant 0 : index
    %c144 = arith.constant 144 : index
    %68 = vector.load %arg15[%c0_60, %c144] : memref<17x192xf32, #tpu.memory_space<vmem>>, vector<17x16xf32>
    %c2_61 = arith.constant 2 : index
    %c1_62 = arith.constant 1 : index
    %c0_63 = arith.constant 0 : index
    %c0_64 = arith.constant 0 : index
    %69 = vector.load %arg16[%c2_61, %c1_62, %c0_63, %c0_64] : memref<3x4x17x16xf32, #tpu.memory_space<vmem>>, vector<1x1x17x16xf32>
    %70 = vector.shape_cast %69 : vector<1x1x17x16xf32> to vector<17x16xf32>
    %71 = vector.shape_cast %68 : vector<17x16xf32> to vector<1x1x17x16xf32>
    tpu.vector_store %arg16[%c2_61, %c1_62, %c0_63, %c0_64], %71 {strides = array<i32>} : memref<3x4x17x16xf32, #tpu.memory_space<vmem>>, vector<1x1x17x16xf32>,
    %c0_65 = arith.constant 0 : index
    %c160 = arith.constant 160 : index
    %72 = vector.load %arg15[%c0_65, %c160] : memref<17x192xf32, #tpu.memory_space<vmem>>, vector<17x16xf32>
    %c2_66 = arith.constant 2 : index
    %c2_67 = arith.constant 2 : index
    %c0_68 = arith.constant 0 : index
    %c0_69 = arith.constant 0 : index
    %73 = vector.load %arg16[%c2_66, %c2_67, %c0_68, %c0_69] : memref<3x4x17x16xf32, #tpu.memory_space<vmem>>, vector<1x1x17x16xf32>
    %74 = vector.shape_cast %73 : vector<1x1x17x16xf32> to vector<17x16xf32>
    %75 = vector.shape_cast %72 : vector<17x16xf32> to vector<1x1x17x16xf32>
    tpu.vector_store %arg16[%c2_66, %c2_67, %c0_68, %c0_69], %75 {strides = array<i32>} : memref<3x4x17x16xf32, #tpu.memory_space<vmem>>, vector<1x1x17x16xf32>,
    %c0_70 = arith.constant 0 : index
    %c176 = arith.constant 176 : index
    %76 = vector.load %arg15[%c0_70, %c176] : memref<17x192xf32, #tpu.memory_space<vmem>>, vector<17x16xf32>
    %c2_71 = arith.constant 2 : index
    %c3_72 = arith.constant 3 : index
    %c0_73 = arith.constant 0 : index
    %c0_74 = arith.constant 0 : index
    %77 = vector.load %arg16[%c2_71, %c3_72, %c0_73, %c0_74] : memref<3x4x17x16xf32, #tpu.memory_space<vmem>>, vector<1x1x17x16xf32>
    %78 = vector.shape_cast %77 : vector<1x1x17x16xf32> to vector<17x16xf32>
    %79 = vector.shape_cast %76 : vector<17x16xf32> to vector<1x1x17x16xf32>
    tpu.vector_store %arg16[%c2_71, %c3_72, %c0_73, %c0_74], %79 {strides = array<i32>} : memref<3x4x17x16xf32, #tpu.memory_space<vmem>>, vector<1x1x17x16xf32>,
    %c0_75 = arith.constant 0 : index
    %c0_76 = arith.constant 0 : index
    %c0_77 = arith.constant 0 : index
    %c0_78 = arith.constant 0 : index
    %80 = vector.load %arg16[%c0_75, %c0_76, %c0_77, %c0_78] : memref<3x4x17x16xf32, #tpu.memory_space<vmem>>, vector<1x4x17x16xf32>
    %81 = vector.shape_cast %80 : vector<1x4x17x16xf32> to vector<4x17x16xf32>
    %82 = arith.truncf %81 : vector<4x17x16xf32> to vector<4x17x16xbf16>
    %c1_79 = arith.constant 1 : index
    %c0_80 = arith.constant 0 : index
    %c0_81 = arith.constant 0 : index
    %c0_82 = arith.constant 0 : index
    %83 = vector.load %arg16[%c1_79, %c0_80, %c0_81, %c0_82] : memref<3x4x17x16xf32, #tpu.memory_space<vmem>>, vector<1x4x17x16xf32>
    %84 = vector.shape_cast %83 : vector<1x4x17x16xf32> to vector<4x17x16xf32>
    %85 = arith.truncf %84 : vector<4x17x16xf32> to vector<4x17x16xbf16>
    %c2_83 = arith.constant 2 : index
    %c0_84 = arith.constant 0 : index
    %c0_85 = arith.constant 0 : index
    %c0_86 = arith.constant 0 : index
    %86 = vector.load %arg16[%c2_83, %c0_84, %c0_85, %c0_86] : memref<3x4x17x16xf32, #tpu.memory_space<vmem>>, vector<1x4x17x16xf32>
    %87 = vector.shape_cast %86 : vector<1x4x17x16xf32> to vector<4x17x16xf32>
    %88 = arith.truncf %87 : vector<4x17x16xf32> to vector<4x17x16xbf16>
    "tpu.trace_start"() <{level = 10 : i32, message = "hqd,hkd->hqk"}> : () -> ()
    %cst_87 = arith.constant dense<0.000000e+00> : vector<4x17x17xf32>
    %89 = tpu.matmul %82, %85, %cst_87 {dimension_numbers = #tpu.dot_dimension_numbers<[2], [2], [1], [1], [0, 0, 0, 1, 1, 1], [0], [0]>} : vector<4x17x16xbf16>, vector<4x17x16xbf16>, vector<4x17x17xf32> -> vector<4x17x17xf32>
    "tpu.trace_stop"() : () -> ()
    %cst_88 = arith.constant dense<0xFF800000> : vector<4x17xf32>
    %90 = vector.multi_reduction <maximumf>, %89, %cst_88 [2] : vector<4x17x17xf32> to vector<4x17xf32>
    %91 = vector.shape_cast %90 : vector<4x17xf32> to vector<4x17x1xf32>
    %92 = vector.broadcast %91 : vector<4x17x1xf32> to vector<4x17x17xf32>
    %93 = arith.subf %89, %92 : vector<4x17x17xf32>
    %94 = math.exp %93 : vector<4x17x17xf32>
    %cst_89 = arith.constant dense<0.000000e+00> : vector<4x17xf32>
    %95 = vector.multi_reduction <add>, %94, %cst_89 [2] : vector<4x17x17xf32> to vector<4x17xf32>
    %96 = vector.shape_cast %95 : vector<4x17xf32> to vector<4x17x1xf32>
    %97 = tpu.reciprocal %96 {approx = true} : vector<4x17x1xf32> -> vector<4x17x1xf32>
    %98 = vector.broadcast %97 : vector<4x17x1xf32> to vector<4x17x17xf32>
    %99 = arith.mulf %94, %98 : vector<4x17x17xf32>
    %100 = arith.truncf %99 : vector<4x17x17xf32> to vector<4x17x17xbf16>
    "tpu.trace_start"() <{level = 10 : i32, message = "hqk,hkd->hqd"}> : () -> ()
    %cst_90 = arith.constant dense<0.000000e+00> : vector<4x17x16xf32>
    %101 = tpu.matmul %100, %88, %cst_90 {dimension_numbers = #tpu.dot_dimension_numbers<[2], [1], [1], [2], [0, 0, 0, 1, 1, 2], [0], [0]>} : vector<4x17x17xbf16>, vector<4x17x16xbf16>, vector<4x17x16xf32> -> vector<4x17x16xf32>
    "tpu.trace_stop"() : () -> ()
    %102 = vector.extract_strided_slice %101 {offsets = [0, 0, 0], sizes = [1, 17, 16], strides = [1, 1, 1]} : vector<4x17x16xf32> to vector<1x17x16xf32>
    %103 = vector.shape_cast %102 : vector<1x17x16xf32> to vector<17x16xf32>
    %c0_91 = arith.constant 0 : index
    %c0_92 = arith.constant 0 : index
    %104 = vector.load %arg17[%c0_91, %c0_92] : memref<17x64xf32, #tpu.memory_space<vmem>>, vector<17x16xf32>
    tpu.vector_store %arg17[%c0_91, %c0_92], %103 {strides = array<i32>} : memref<17x64xf32, #tpu.memory_space<vmem>>, vector<17x16xf32>,
    %105 = vector.extract_strided_slice %101 {offsets = [1, 0, 0], sizes = [1, 17, 16], strides = [1, 1, 1]} : vector<4x17x16xf32> to vector<1x17x16xf32>
    %106 = vector.shape_cast %105 : vector<1x17x16xf32> to vector<17x16xf32>
    %c0_93 = arith.constant 0 : index
    %c16_94 = arith.constant 16 : index
    %107 = vector.load %arg17[%c0_93, %c16_94] : memref<17x64xf32, #tpu.memory_space<vmem>>, vector<17x16xf32>
    tpu.vector_store %arg17[%c0_93, %c16_94], %106 {strides = array<i32>} : memref<17x64xf32, #tpu.memory_space<vmem>>, vector<17x16xf32>,
    %108 = vector.extract_strided_slice %101 {offsets = [2, 0, 0], sizes = [1, 17, 16], strides = [1, 1, 1]} : vector<4x17x16xf32> to vector<1x17x16xf32>
    %109 = vector.shape_cast %108 : vector<1x17x16xf32> to vector<17x16xf32>
    %c0_95 = arith.constant 0 : index
    %c32_96 = arith.constant 32 : index
    %110 = vector.load %arg17[%c0_95, %c32_96] : memref<17x64xf32, #tpu.memory_space<vmem>>, vector<17x16xf32>
    tpu.vector_store %arg17[%c0_95, %c32_96], %109 {strides = array<i32>} : memref<17x64xf32, #tpu.memory_space<vmem>>, vector<17x16xf32>,
    %111 = vector.extract_strided_slice %101 {offsets = [3, 0, 0], sizes = [1, 17, 16], strides = [1, 1, 1]} : vector<4x17x16xf32> to vector<1x17x16xf32>
    %112 = vector.shape_cast %111 : vector<1x17x16xf32> to vector<17x16xf32>
    %c0_97 = arith.constant 0 : index
    %c48_98 = arith.constant 48 : index
    %113 = vector.load %arg17[%c0_97, %c48_98] : memref<17x64xf32, #tpu.memory_space<vmem>>, vector<17x16xf32>
    tpu.vector_store %arg17[%c0_97, %c48_98], %112 {strides = array<i32>} : memref<17x64xf32, #tpu.memory_space<vmem>>, vector<17x16xf32>,
    %c0_99 = arith.constant 0 : index
    %c0_100 = arith.constant 0 : index
    %114 = vector.load %arg17[%c0_99, %c0_100] : memref<17x64xf32, #tpu.memory_space<vmem>>, vector<17x64xf32>
    %115 = arith.truncf %114 : vector<17x64xf32> to vector<17x64xbf16>
    %c0_101 = arith.constant 0 : index
    %c0_102 = arith.constant 0 : index
    %116 = vector.load %arg6[%c0_101, %c0_102] : memref<64x64xbf16, #tpu.memory_space<vmem>>, vector<64x64xbf16>
    %cst_103 = arith.constant dense<0.000000e+00> : vector<17x64xf32>
    %117 = tpu.matmul %115, %116, %cst_103 {dimension_numbers = #tpu.dot_dimension_numbers<[1], [0], [0], [1], [0, 0, 1, 1], [], []>} : vector<17x64xbf16>, vector<64x64xbf16>, vector<17x64xf32> -> vector<17x64xf32>
    %118 = arith.addf %2, %117 : vector<17x64xf32>
    %c0_104 = arith.constant 0 : index
    %c0_105 = arith.constant 0 : index
    %119 = vector.load %arg7[%c0_104, %c0_105] : memref<1x64xf32, #tpu.memory_space<vmem>>, vector<1x64xf32>
    %120 = vector.broadcast %119 : vector<1x64xf32> to vector<17x64xf32>
    %121 = arith.addf %118, %120 : vector<17x64xf32>
    %c0_106 = arith.constant 0 : index
    %c0_107 = arith.constant 0 : index
    %122 = vector.load %arg8[%c0_106, %c0_107] : memref<1x64xf32, #tpu.memory_space<vmem>>, vector<1x64xf32>
    %c0_108 = arith.constant 0 : index
    %c0_109 = arith.constant 0 : index
    %123 = vector.load %arg9[%c0_108, %c0_109] : memref<1x64xf32, #tpu.memory_space<vmem>>, vector<1x64xf32>
    %cst_110 = arith.constant dense<0.000000e+00> : vector<17xf32>
    %124 = vector.multi_reduction <add>, %121, %cst_110 [1] : vector<17x64xf32> to vector<17xf32>
    %125 = vector.shape_cast %124 : vector<17xf32> to vector<17x1xf32>
    %cst_111 = arith.constant 6.400000e+01 : f32
    %126 = vector.broadcast %cst_111 : f32 to vector<17x1xf32>
    %127 = arith.divf %125, %126 : vector<17x1xf32>
    %128 = vector.broadcast %127 : vector<17x1xf32> to vector<17x64xf32>
    %129 = arith.subf %121, %128 : vector<17x64xf32>
    %130 = arith.mulf %129, %129 : vector<17x64xf32>
    %cst_112 = arith.constant dense<0.000000e+00> : vector<17xf32>
    %131 = vector.multi_reduction <add>, %130, %cst_112 [1] : vector<17x64xf32> to vector<17xf32>
    %132 = vector.shape_cast %131 : vector<17xf32> to vector<17x1xf32>
    %cst_113 = arith.constant 6.400000e+01 : f32
    %133 = vector.broadcast %cst_113 : f32 to vector<17x1xf32>
    %134 = arith.divf %132, %133 : vector<17x1xf32>
    %cst_114 = arith.constant 9.99999997E-7 : f32
    %135 = vector.broadcast %cst_114 : f32 to vector<17x1xf32>
    %136 = arith.addf %134, %135 : vector<17x1xf32>
    %137 = math.rsqrt %136 : vector<17x1xf32>
    %138 = vector.broadcast %137 : vector<17x1xf32> to vector<17x64xf32>
    %139 = arith.mulf %129, %138 : vector<17x64xf32>
    %140 = vector.broadcast %122 : vector<1x64xf32> to vector<17x64xf32>
    %141 = arith.mulf %139, %140 : vector<17x64xf32>
    %142 = vector.broadcast %123 : vector<1x64xf32> to vector<17x64xf32>
    %143 = arith.addf %141, %142 : vector<17x64xf32>
    %144 = arith.truncf %143 : vector<17x64xf32> to vector<17x64xbf16>
    %c0_115 = arith.constant 0 : index
    %c0_116 = arith.constant 0 : index
    %145 = vector.load %arg10[%c0_115, %c0_116] : memref<64x256xbf16, #tpu.memory_space<vmem>>, vector<64x256xbf16>
    %cst_117 = arith.constant dense<0.000000e+00> : vector<17x256xf32>
    %146 = tpu.matmul %144, %145, %cst_117 {dimension_numbers = #tpu.dot_dimension_numbers<[1], [0], [0], [1], [0, 0, 1, 1], [], []>} : vector<17x64xbf16>, vector<64x256xbf16>, vector<17x256xf32> -> vector<17x256xf32>
    %c0_118 = arith.constant 0 : index
    %c0_119 = arith.constant 0 : index
    %147 = vector.load %arg11[%c0_118, %c0_119] : memref<1x256xf32, #tpu.memory_space<vmem>>, vector<1x256xf32>
    %148 = vector.broadcast %147 : vector<1x256xf32> to vector<17x256xf32>
    %149 = arith.addf %146, %148 : vector<17x256xf32>
    %cst_120 = arith.constant 5.000000e-01 : f32
    %150 = vector.broadcast %cst_120 : f32 to vector<17x256xf32>
    %151 = arith.mulf %150, %149 : vector<17x256xf32>
    %cst_121 = arith.constant 4.471500e-02 : f32
    %152 = vector.broadcast %cst_121 : f32 to vector<17x256xf32>
    %153 = arith.mulf %152, %149 : vector<17x256xf32>
    %154 = arith.mulf %153, %149 : vector<17x256xf32>
    %155 = arith.mulf %154, %149 : vector<17x256xf32>
    %156 = arith.addf %149, %155 : vector<17x256xf32>
    %cst_122 = arith.constant 0.797884583 : f32
    %157 = vector.broadcast %cst_122 : f32 to vector<17x256xf32>
    %158 = arith.mulf %157, %156 : vector<17x256xf32>
    %159 = math.tanh %158 : vector<17x256xf32>
    %cst_123 = arith.constant 1.000000e+00 : f32
    %160 = vector.broadcast %cst_123 : f32 to vector<17x256xf32>
    %161 = arith.addf %160, %159 : vector<17x256xf32>
    %162 = arith.mulf %151, %161 : vector<17x256xf32>
    %163 = arith.truncf %162 : vector<17x256xf32> to vector<17x256xbf16>
    %c0_124 = arith.constant 0 : index
    %c0_125 = arith.constant 0 : index
    %164 = vector.load %arg12[%c0_124, %c0_125] : memref<256x64xbf16, #tpu.memory_space<vmem>>, vector<256x64xbf16>
    %cst_126 = arith.constant dense<0.000000e+00> : vector<17x64xf32>
    %165 = tpu.matmul %163, %164, %cst_126 {dimension_numbers = #tpu.dot_dimension_numbers<[1], [0], [0], [1], [0, 0, 1, 1], [], []>} : vector<17x256xbf16>, vector<256x64xbf16>, vector<17x64xf32> -> vector<17x64xf32>
    %c0_127 = arith.constant 0 : index
    %c0_128 = arith.constant 0 : index
    %166 = vector.load %arg13[%c0_127, %c0_128] : memref<1x64xf32, #tpu.memory_space<vmem>>, vector<1x64xf32>
    %167 = vector.broadcast %166 : vector<1x64xf32> to vector<17x64xf32>
    %168 = arith.addf %165, %167 : vector<17x64xf32>
    %169 = arith.addf %121, %168 : vector<17x64xf32>
    %170 = arith.truncf %169 : vector<17x64xf32> to vector<17x64xbf16>
    %c0_129 = arith.constant 0 : index
    %c0_130 = arith.constant 0 : index
    %c0_131 = arith.constant 0 : index
    %171 = vector.load %arg14[%c0_129, %c0_130, %c0_131] : memref<1x17x64xbf16, #tpu.memory_space<vmem>>, vector<1x17x64xbf16>
    %172 = vector.shape_cast %171 : vector<1x17x64xbf16> to vector<17x64xbf16>
    %173 = vector.shape_cast %170 : vector<17x64xbf16> to vector<1x17x64xbf16>
    tpu.vector_store %arg14[%c0_129, %c0_130, %c0_131], %173 {strides = array<i32>} : memref<1x17x64xbf16, #tpu.memory_space<vmem>>, vector<1x17x64xbf16>,
    return
  }
  func.func @transform_0(%arg0: i32) -> (i32, i32, i32) {
    %c0_i32 = arith.constant 0 : i32
    %c0_i32_0 = arith.constant 0 : i32
    %c0_i32_1 = arith.constant 0 : i32
    return %arg0, %c0_i32, %c0_i32_0 : i32, i32, i32
  }
  func.func @transform_1(%arg0: i32) -> (i32, i32) {
    %c0_i32 = arith.constant 0 : i32
    %c0_i32_0 = arith.constant 0 : i32
    %c0_i32_1 = arith.constant 0 : i32
    return %c0_i32, %c0_i32_0 : i32, i32
  }
  func.func @transform_2(%arg0: i32) -> (i32, i32) {
    %c0_i32 = arith.constant 0 : i32
    %c0_i32_0 = arith.constant 0 : i32
    %c0_i32_1 = arith.constant 0 : i32
    return %c0_i32, %c0_i32_0 : i32, i32
  }
  func.func @transform_3(%arg0: i32) -> (i32, i32) {
    %c0_i32 = arith.constant 0 : i32
    %c0_i32_0 = arith.constant 0 : i32
    %c0_i32_1 = arith.constant 0 : i32
    return %c0_i32, %c0_i32_0 : i32, i32
  }
  func.func @transform_4(%arg0: i32) -> (i32, i32) {
    %c0_i32 = arith.constant 0 : i32
    %c0_i32_0 = arith.constant 0 : i32
    %c0_i32_1 = arith.constant 0 : i32
    return %c0_i32, %c0_i32_0 : i32, i32
  }
  func.func @transform_5(%arg0: i32) -> (i32, i32) {
    %c0_i32 = arith.constant 0 : i32
    %c0_i32_0 = arith.constant 0 : i32
    %c0_i32_1 = arith.constant 0 : i32
    return %c0_i32, %c0_i32_0 : i32, i32
  }
  func.func @transform_6(%arg0: i32) -> (i32, i32) {
    %c0_i32 = arith.constant 0 : i32
    %c0_i32_0 = arith.constant 0 : i32
    %c0_i32_1 = arith.constant 0 : i32
    return %c0_i32, %c0_i32_0 : i32, i32
  }
  func.func @transform_7(%arg0: i32) -> (i32, i32) {
    %c0_i32 = arith.constant 0 : i32
    %c0_i32_0 = arith.constant 0 : i32
    %c0_i32_1 = arith.constant 0 : i32
    return %c0_i32, %c0_i32_0 : i32, i32
  }
  func.func @transform_8(%arg0: i32) -> (i32, i32) {
    %c0_i32 = arith.constant 0 : i32
    %c0_i32_0 = arith.constant 0 : i32
    %c0_i32_1 = arith.constant 0 : i32
    return %c0_i32, %c0_i32_0 : i32, i32
  }
  func.func @transform_9(%arg0: i32) -> (i32, i32) {
    %c0_i32 = arith.constant 0 : i32
    %c0_i32_0 = arith.constant 0 : i32
    %c0_i32_1 = arith.constant 0 : i32
    return %c0_i32, %c0_i32_0 : i32, i32
  }
  func.func @transform_10(%arg0: i32) -> (i32, i32) {
    %c0_i32 = arith.constant 0 : i32
    %c0_i32_0 = arith.constant 0 : i32
    %c0_i32_1 = arith.constant 0 : i32
    return %c0_i32, %c0_i32_0 : i32, i32
  }
  func.func @transform_11(%arg0: i32) -> (i32, i32) {
    %c0_i32 = arith.constant 0 : i32
    %c0_i32_0 = arith.constant 0 : i32
    %c0_i32_1 = arith.constant 0 : i32
    return %c0_i32, %c0_i32_0 : i32, i32
  }
  func.func @transform_12(%arg0: i32) -> (i32, i32) {
    %c0_i32 = arith.constant 0 : i32
    %c0_i32_0 = arith.constant 0 : i32
    %c0_i32_1 = arith.constant 0 : i32
    return %c0_i32, %c0_i32_0 : i32, i32
  }
  func.func @transform_13(%arg0: i32) -> (i32, i32, i32) {
    %c0_i32 = arith.constant 0 : i32
    %c0_i32_0 = arith.constant 0 : i32
    %c0_i32_1 = arith.constant 0 : i32
    return %arg0, %c0_i32, %c0_i32_0 : i32, i32, i32
  }
}

</mosaic_0001>

<bundles_post_ra>
// kernel: _lambda_.4
= control target key start
LH: loop header
LB: loop body
LE: loop exit
PB: predicated region body
PF: predicated region fallthrough
CT: control target
= control target key end

     0   :  { %s518_s12 = smov 0   ;;  %s616_s0 = inlined_call_operand.vmem [shape: f32[2,17,192], index: 0, kind: input, shape index: {}]   ;;  %s617_s1 = inlined_call_operand.vmem [shape: bf16[192,64], index: 1, kind: input, shape index: {}]   ;;  %s618_s2 = inlined_call_operand.vmem [shape: f32[17,64], index: 2, kind: input, shape index: {}]   ;;  %s619_s3 = inlined_call_operand.vmem [shape: bf16[2,17,64], index: 3, kind: output, shape index: {}]  }
   0x1 LB: > { %s413_s13 = sadd.s32 4294967295, %s495_s12   ;;  %p417_p0 = scmp.ge.s32.totalorder %s495_s12, 1  ;;  %s495_s12 = sphi %s518_s12, %s13_s12  }
   0x2   : > { %p137_p1 = scmp.lt.s32.totalorder %s495_s12, 3 }
   0x4   : > { %p138_p2 = pnand %p417_p0, %p137_p1 }
   0x5   : > { %v477_v0 = vld [vmem:[%s617_s1] sm:$0xff] (!%p138_p2)   ;;  %v497_v1 = vmov (!%p138_p2), 0   ;;  %p161_p3 = scmp.lt.s32.totalorder (!%p138_p2), %s413_s13, 1  ;;  %v478_v2 = vld [vmem:[%s617_s1 + $0x8] sm:$0xff] (!%p138_p2)   ;;  %v479_v3 = vld [vmem:[%s617_s1 + $0x10] sm:$0xff] (!%p138_p2)   ;;  %vm281_vm0 = vcmask (!%p138_p2), 523264  }
   0x6   : > { %141 = sbr.rel (%p138_p2) target bundleno = 273 (0x111), region = 32  ;;  %288 = vmatprep.subr.bf16.mxu0 (!%p138_p2), %v497_v1  ;;  %442 = vmatprep.subr.bf16.mxu1 (!%p138_p2), %v497_v1  ;;  %v480_v4 = vld [vmem:[%s617_s1 + $0x18] sm:$0xff] (!%p138_p2)   ;;  %v481_v10 = vld [vmem:[%s617_s1 + $0x20] sm:$0xff] (!%p138_p2)   ;;  %v482_v11 = vld [vmem:[%s617_s1 + $0x28] sm:$0xff] (!%p138_p2)   ;;  %vm352_vm1 = vcmask (!%p138_p2), 516096   ;;  %vm349_vm3 = vcmask (!%p138_p2), 519168  }
   0x7   : > { %289 = vmatpush1.bf16.msra.mxu0 (!%p138_p2), %v477_v0  ;;  %454 = vmatpush1.bf16.msra.mxu1 (!%p138_p2), %v477_v0  ;;  %v483_v12 = vld [vmem:[%s617_s1 + $0x30] sm:$0xff] (!%p138_p2)   ;;  %v484_v13 = vld [vmem:[%s617_s1 + $0x38] sm:$0xff] (!%p138_p2)   ;;  %v485_v14 = vld [vmem:[%s617_s1 + $0x40] sm:$0xff] (!%p138_p2)   ;;  %vm353_vm2 = vsmask.f32 (!%p138_p2), 256 }
   0x8   : > { %290 = vmatprep.subr.bf16.mxu0 (!%p138_p2), %v497_v1  ;;  %443 = vmatprep.subr.bf16.mxu1 (!%p138_p2), %v497_v1  ;;  %v486_v15 = vld [vmem:[%s617_s1 + $0x48] sm:$0xff] (!%p138_p2)   ;;  %v487_v16 = vld [vmem:[%s617_s1 + $0x50] sm:$0xff] (!%p138_p2)   ;;  %v488_v17 = vld [vmem:[%s617_s1 + $0x58] sm:$0xff] (!%p138_p2)  }
   0x9   : > { %v206_v23 = vld [vmem:[%s618_s2] sm:$0xff] (!%p138_p2)  ;;  %v208_v24 = vld [vmem:[%s618_s2 + $0x10] sm:$0x1] (!%p138_p2)  ;;  %v207_v27 = vld [vmem:[%s618_s2 + $0x8] sm:$0xff] (!%p138_p2) }
   0xa   : > { %vm354_vm4 = vmand (!%p138_p2), %vm352_vm1, %vm353_vm2 }
   0xb   : > { %291 = vmatpush1.bf16.msra.mxu0 (!%p138_p2), %v478_v2  ;;  %455 = vmatpush1.bf16.msra.mxu1 (!%p138_p2), %v478_v2 }
   0xc   : > { %292 = vmatprep.subr.bf16.mxu0 (!%p138_p2), %v497_v1  ;;  %444 = vmatprep.subr.bf16.mxu1 (!%p138_p2), %v497_v1 }
   0xd   : > { %s621_s13 = smov (!%p161_p3, %s413_s13), 1 }
   0xe   : > { %s466_s18 = smul.u32 48, %s621_s13 }
   0xf   : > { %293 = vmatpush1.bf16.msra.mxu0 %v479_v3  ;;  %456 = vmatpush1.bf16.msra.mxu1 %v479_v3  ;;  %s467_s17 = smul.u32 12, %s621_s13 }
  0x10   : > { %s547_s23 = scalar_lea.vmem %s616_s0, %s466_s18  ;;  %294 = vmatprep.subr.bf16.mxu0 %v497_v1  ;;  %445 = vmatprep.subr.bf16.mxu1 %v497_v1 }
  0x11   : > { %v173_v5 = vld [vmem:[%s547_s23 + $0x8] sm:$0xff]  ;;  %v175_v6 = vld [vmem:[%s547_s23 + $0x18] sm:$0xff]  ;;  %v172_v18 = vld [vmem:[%s547_s23] sm:$0xff]  ;;  %s170_s24 = scalar_lea.vmem %s619_s3, %s467_s17 }
  0x12   : > { %v177_v7 = vld [vmem:[%s547_s23 + $0x28] sm:$0x1]  ;;  %v179_v8 = vpack.c.bf16 %v175_v6, %v173_v5  ;;  %v174_v19 = vld [vmem:[%s547_s23 + $0x10] sm:$0xff]  ;;  %v176_v20 = vld [vmem:[%s547_s23 + $0x20] sm:$0x1] }
  0x13   : > { %v181_v9 = vpack.c.bf16 %v177_v7, %v177_v7  ;;  %295 = vmatpush1.bf16.msra.mxu0 %v480_v4  ;;  %457 = vmatpush1.bf16.msra.mxu1 %v480_v4  ;;  %v178_v21 = vpack.c.bf16 %v174_v19, %v172_v18  ;;  %v180_v22 = vpack.c.bf16 %v176_v20, %v176_v20  ;;  %v355_v32 = vld [vmem:[%s170_s24 + $0x8] sm:$0x1] }
  0x14   : > { %296 = vmatprep.subr.bf16.mxu0 %v497_v1  ;;  %446 = vmatprep.subr.bf16.mxu1 %v497_v1 }
  0x15   : > { %432 = vmatprep.mubr.msk.bf16.mxu0 %vm281_vm0, %v179_v8  ;;  %433 = vmatprep.mubr.msk.bf16.mxu1 %vm281_vm0, %v181_v9 }
  0x17   : > { %297 = vmatpush1.bf16.msra.mxu0 %v481_v10  ;;  %458 = vmatpush1.bf16.msra.mxu1 %v481_v10 }
  0x18   : > { %298 = vmatprep.subr.bf16.mxu0 %v497_v1  ;;  %447 = vmatprep.subr.bf16.mxu1 %v497_v1 }
  0x1b   : > { %299 = vmatpush1.bf16.msra.mxu0 %v482_v11  ;;  %459 = vmatpush1.bf16.msra.mxu1 %v482_v11 }
  0x1c   : > { %300 = vmatprep.subr.bf16.mxu0 %v497_v1  ;;  %448 = vmatprep.subr.bf16.mxu1 %v497_v1 }
  0x1f   : > { %301 = vmatpush1.bf16.msra.mxu0 %v483_v12  ;;  %460 = vmatpush1.bf16.msra.mxu1 %v483_v12 }
  0x20   : > { %302 = vmatprep.subr.bf16.mxu0 %v497_v1  ;;  %449 = vmatprep.subr.bf16.mxu1 %v497_v1 }
  0x23   : > { %303 = vmatpush1.bf16.msra.mxu0 %v484_v13  ;;  %461 = vmatpush1.bf16.msra.mxu1 %v484_v13 }
  0x24   : > { %304 = vmatprep.subr.bf16.mxu0 %v497_v1  ;;  %450 = vmatprep.subr.bf16.mxu1 %v497_v1 }
  0x27   : > { %305 = vmatpush1.bf16.msra.mxu0 %v485_v14  ;;  %462 = vmatpush1.bf16.msra.mxu1 %v485_v14 }
  0x28   : > { %306 = vmatprep.subr.bf16.mxu0 %v497_v1  ;;  %451 = vmatprep.subr.bf16.mxu1 %v497_v1 }
  0x2b   : > { %307 = vmatpush1.bf16.msra.mxu0 %v486_v15  ;;  %463 = vmatpush1.bf16.msra.mxu1 %v486_v15 }
  0x2c   : > { %308 = vmatprep.subr.bf16.mxu0 %v497_v1  ;;  %452 = vmatprep.subr.bf16.mxu1 %v497_v1 }
  0x2f   : > { %309 = vmatpush1.bf16.msra.mxu0 %v487_v16  ;;  %464 = vmatpush1.bf16.msra.mxu1 %v487_v16 }
  0x30   : > { %310 = vmatprep.subr.bf16.mxu0 %v497_v1  ;;  %453 = vmatprep.subr.bf16.mxu1 %v497_v1 }
  0x33   : > { %311 = vmatpush1.bf16.msra.mxu0 %v488_v17  ;;  %465 = vmatpush1.bf16.msra.mxu1 %v488_v17 }
  0x36   : > { %321 = vmatmul.mubr.bf16.vlgmr.msra.gmra.mrb[0].mxu0 %v178_v21  ;;  %329 = vmatmul.mubr.bf16.vlgmr.msra.gmra.mrb[0].mxu1 %v180_v22 }
 0x109   : > { %v322_v25 = vpop.f32.mrb[0].mxu0  ;;  %v330_v26 = vpop.f32.mrb[0].mxu1 }
 0x10a   : > { %v323_v28 = vadd.f32 %v322_v25, %v206_v23  ;;  %v331_v29 = vadd.f32 %v330_v26, %v208_v24  ;;  %v324_v30 = vpop.f32.mrb[1].mxu0  ;;  %v332_v31 = vpop.f32.mrb[1].mxu1 }
 0x10b   : > { %v325_v33 = vpop.f32.mrb[2].mxu0  ;;  %v333_v34 = vpop.f32.mrb[2].mxu1 }
 0x10c   : > { %v439_v35 = vpack.c.bf16 %v323_v28, %v323_v28  ;;  %v441_v36 = vpack.c.bf16 %v331_v29, %v331_v29  ;;  %v326_v37 = vadd.f32 %v325_v33, %v207_v27  ;;  %v327_v38 = vpop.f32.mrb[3].mxu0  ;;  %v334_v39 = vpop.f32.mrb[3].mxu1 }
 0x10e   : > { %350 = vst.msk [vmem:[%s170_s24] sm:$0xf] %vm349_vm3, %v439_v35  ;;  %v356_v40 = vsel %vm354_vm4, %v441_v36, %v355_v32  ;;  %v440_v41 = vpack.c.bf16 %v326_v37, %v326_v37 }
 0x10f   : > { %357 = vst [vmem:[%s170_s24 + $0x8] sm:$0x1] %v356_v40 }
 0x110   : > { %351 = vst.msk [vmem:[%s170_s24 + $0x4] sm:$0xf] %vm349_vm3, %v440_v41 }
 0x111 PF: > { %s13_s12 = sadd.s32 1, %s495_s12  }
 0x112   : > { %p10_p4 = scmp.ge.s32.totalorder %s13_s12, 4  }
 0x114   :  { %12 = sbr.rel (!%p10_p4) target bundleno = 1 (0x1), region = 62 }

// kernel: _lambda_.7
= control target key start
LH: loop header
LB: loop body
LE: loop exit
PB: predicated region body
PF: predicated region fallthrough
CT: control target
= control target key end

     0   :  { %vm23_vm0 = vcmask 517120   ;;  %s263_s0 = inlined_call_operand.vmem [shape: bf16[2,64], index: 0, kind: input, shape index: {}]   ;;  %s264_s1 = inlined_call_operand.vmem [shape: f32[1,64], index: 1, kind: input, shape index: {}]   ;;  %s265_s2 = inlined_call_operand.vmem [shape: f32[1,64], index: 2, kind: input, shape index: {}]   ;;  %s266_s3 = inlined_call_operand.vmem [shape: bf16[64,32], index: 3, kind: input, shape index: {}]   ;;  %s267_s4 = inlined_call_operand.hbm [shape: f32[2,32], index: 4, kind: output, shape index: {}]  }
   0x1   :  { %v19_v0 = vld [vmem:[%s263_s0] sm:$0x1] }
   0x2   :  { %v20_v1 = vunpack.c.l.bf16 %v19_v0 }
   0x4   :  { %v24_v2 = vsel %vm23_vm0, %v20_v1, 0.0 }
   0x5   :  { %9 = vsyncpa [#allocation3], 0  ;;  %25 = vadd.xlane.f32.xlu0 %v24_v2  ;;  %v172_v8 = vld [vmem:[%s266_s3] sm:$0xff]   ;;  %v202_v9 = vmov 0.0   ;;  %v173_v10 = vld [vmem:[%s266_s3 + $0x8] sm:$0xff]   ;;  %vm203_vm1 = vmmov 0  }
   0x6   :  { %157 = vmatprep.subr.bf16.mxu0 %v202_v9  ;;  %v174_v11 = vld [vmem:[%s266_s3 + $0x10] sm:$0xff]   ;;  %v175_v12 = vld [vmem:[%s266_s3 + $0x18] sm:$0xff]   ;;  %165 = vmatprep.mubr.msk.bf16.mxu0 %vm203_vm1, %v202_v9  ;;  %v145_v17 = vld [vmem:[%s264_s1] ss:$0 sm:$0xff]  ;;  %vm85_vm2 = vcmask 523264   ;;  %s204_s3 = smov [#allocation2]  }
   0x7   :  { %158 = vmatpush3.bf16.msra.mxu0 %v172_v8  ;;  %v146_v19 = vld [vmem:[%s265_s2] ss:$0 sm:$0xff]  ;;  %s137_s28 = sshll.u32 %s204_s3, 4  ;;  %vm129_vm3 = vcmask 254976   ;;  %s138_s28 = int_to_ptr.vmem [resolvable:$true] %s137_s28 }
   0x8   :  { %159 = vmatprep.subr.bf16.mxu0 %v202_v9  ;;  %s178_s29 = scalar_lea.vmem %s138_s28, 32  ;;  %p183_p1 = scmp.lt.s32.totalorder %s138_s28, %s138_s28 }
   0x9   :  { %p179_p0 = scmp.ne.s32.totalorder %s138_s28, %s178_s29  ;;  %p184_p2 = scmp.lt.s32.totalorder %s178_s29, %s178_s29 }
   0xb   :  { %160 = vmatpush3.bf16.msra.mxu0 %v173_v10  ;;  %p185_p3 = por %p184_p2, %p183_p1 }
   0xc   :  { %161 = vmatprep.subr.bf16.mxu0 %v202_v9 }
   0xd   :  { %p186_p4 = pnand %p185_p3, %p179_p0 }
   0xf   :  { %162 = vmatpush3.bf16.msra.mxu0 %v174_v11 }
  0x10   :  { %163 = vmatprep.subr.bf16.mxu0 %v202_v9 }
  0x13   :  { %164 = vmatpush3.bf16.msra.mxu0 %v175_v12 }
  0x92   :  { %v26_v3 = vpop.xlane.xlu0 %25 }
  0x93   :  { %v28_v4 = vmul.f32 0.015625, %v26_v3 }
  0x95   :  { %v29_v5 = vsub.f32 %v20_v1, %v28_v4 }
  0x97   :  { %v30_v6 = vmul.f32 %v29_v5, %v29_v5 }
  0x99   :  { %v31_v7 = vsel %vm23_vm0, %v30_v6, 0.0 }
  0x9a   :  { %32 = vadd.xlane.f32.xlu0 %v31_v7 }
 0x127   :  { %v33_v13 = vpop.xlane.xlu0 %32 }
 0x128   :  { %v34_v14 = vmul.f32 0.015625, %v33_v13 }
 0x12a   :  { %v35_v15 = vadd.f32 1e-06, %v34_v14 }
 0x12c   :  { %176 = vrsqrt.f32 %v35_v15 }
 0x136   :  { %v177_v16 = vpop.eup %176 }
 0x137   :  { %v37_v18 = vmul.f32 %v177_v16, %v29_v5 }
 0x139   :  { %v44_v20 = vmul.f32 %v145_v17, %v37_v18 }
 0x13b   :  { %v51_v21 = vadd.f32 %v146_v19, %v44_v20 }
 0x13d   :  { %v52_v22 = vpack.c.bf16 %v51_v21, %v51_v21 }
 0x13f   :  { %166 = vmatmul.mubr.msk.bf16.vlgmr.msra.gmra.mrb[0].mxu0 %vm85_vm2, %v52_v22 }
 0x212   :  { %v123_v23 = vpop.f32.mrb[0].mxu0 }
 0x213   :  { %130 = vst.msk [vmem:[#allocation2] sm:$0x3] %vm129_vm3, %v123_v23  ;;  %v167_v24 = vpop.f32.mrb[1].mxu0 }
 0x214   :  { %v126_v25 = vpop.f32.mrb[2].mxu0 }
 0x215   :  { %189 = shalt.err (!%p186_p4)
}
 0x216   :  { %s190_s30 = scalar_lea.hbm %s267_s4, 32 }
 0x217   :  { %p191_p5 = scmp.ne.s32.totalorder %s267_s4, %s190_s30  ;;  %p194_p6 = scmp.lt.u32.totalorder %s190_s30, %s267_s4 }
 0x219   :  { %p196_p7 = pnand %p194_p6, %p191_p5 }
 0x21b   :  { %199 = shalt.err (!%p196_p7)
}
 0x21c   :  { %140 = dma.vmem_to_hbm [thread:$0]  %s138_s28, 32, %s267_s4, [#allocation3]   ;;  %v168_v26 = vpop.f32.mrb[3].mxu0 }
 0x21d   :  { %200 = dma.done.wait [#allocation3], 32  }
 0x21e   :  { %201 = vsyncadd [#allocation3], 4294967264 }
 0x21f   :  { %144 = vsyncpa [#allocation3], 1 }

// kernel: _lambda_.5
= control target key start
LH: loop header
LB: loop body
LE: loop exit
PB: predicated region body
PF: predicated region fallthrough
CT: control target
= control target key end

     0   :  { %s2622_s25 = smov 0   ;;  %s3083_s0 = inlined_call_operand.vmem [shape: bf16[2,17,64], index: 0, kind: input, shape index: {}]   ;;  %s3084_s1 = inlined_call_operand.vmem [shape: f32[1,64], index: 1, kind: input, shape index: {}]   ;;  %s3085_s2 = inlined_call_operand.vmem [shape: f32[1,64], index: 2, kind: input, shape index: {}]   ;;  %s3086_s3 = inlined_call_operand.vmem [shape: bf16[64,192], index: 3, kind: input, shape index: {}]   ;;  %s3087_s4 = inlined_call_operand.vmem [shape: f32[1,192], index: 4, kind: input, shape index: {}]   ;;  %s3088_s5 = inlined_call_operand.vmem [shape: bf16[64,64], index: 5, kind: input, shape index: {}]   ;;  %s3089_s6 = inlined_call_operand.vmem [shape: f32[1,64], index: 6, kind: input, shape index: {}]   ;;  %s3090_s7 = inlined_call_operand.vmem [shape: f32[1,64], index: 7, kind: input, shape index: {}]   ;;  %s3091_s8 = inlined_call_operand.vmem [shape: f32[1,64], index: 8, kind: input, shape index: {}]   ;;  %s3092_s9 = inlined_call_operand.vmem [shape: bf16[64,256], index: 9, kind: input, shape index: {}]   ;;  %s3093_s10 = inlined_call_operand.vmem [shape: f32[1,256], index: 10, kind: input, shape index: {}]   ;;  %s3094_s11 = inlined_call_operand.vmem [shape: bf16[256,64], index: 11, kind: input, shape index: {}]   ;;  %s3095_s12 = inlined_call_operand.vmem [shape: f32[1,64], index: 12, kind: input, shape index: {}]   ;;  %s3096_s13 = inlined_call_operand.vmem [shape: bf16[2,17,64], index: 13, kind: output, shape index: {}]  }
   0x1 LB: > { %s2170_s26 = sadd.s32 4294967295, %s2542_s25   ;;  %p2174_p0 = scmp.ge.s32.totalorder %s2542_s25, 1  ;;  %s2542_s25 = sphi %s2622_s25, %s23_s25  }
   0x2   : > { %p387_p1 = scmp.lt.s32.totalorder %s2542_s25, 3 }
   0x4   : > { %p388_p2 = pnand %p2174_p0, %p387_p1 }
   0x5   : > { %p431_p3 = scmp.lt.s32.totalorder (!%p388_p2), %s2170_s26, 1  ;;  %vm450_vm0 = vcmask (!%p388_p2), 523264   ;;  %vm457_vm1 = vcmask (!%p388_p2), 516096   ;;  %v2420_v23 = vld [vmem:[%s3086_s3 + $0x4] ss:$8 sps:$4 sm:$0xff] (!%p388_p2)   ;;  %v2544_v31 = vmov (!%p388_p2), 0   ;;  %v522_v57 = vlaneseq (!%p388_p2) }
   0x6   : > { %391 = sbr.rel (%p388_p2) target bundleno = 2667 (0xa6b), region = 72  ;;  %v2422_v24 = vld [vmem:[%s3086_s3] ss:$8 sps:$4 sm:$0xff] (!%p388_p2)   ;;  %578 = vmatprep.subr.bf16.mxu1 (!%p388_p2), %v2420_v23  ;;  %v2423_v25 = vld [vmem:[%s3086_s3 + $0x14] ss:$8 sps:$4 sm:$0xff] (!%p388_p2)   ;;  %610 = vmatprep.mubr.bf16.mxu1 (!%p388_p2), %v2544_v31  ;;  %vm638_vm2 = vcmask (!%p388_p2), 130048  }
   0x7   : > { %579 = vmatpush1.bf16.msra.mxu1 (!%p388_p2), %v2422_v24  ;;  %v2425_v26 = vld [vmem:[%s3086_s3 + $0x10] ss:$8 sps:$4 sm:$0xff] (!%p388_p2)   ;;  %v2426_v27 = vld [vmem:[%s3086_s3 + $0x24] ss:$8 sps:$4 sm:$0xff] (!%p388_p2)   ;;  %v2428_v28 = vld [vmem:[%s3086_s3 + $0x20] ss:$8 sps:$4 sm:$0xff] (!%p388_p2)  }
   0x8   : > { %580 = vmatprep.subr.bf16.mxu1 (!%p388_p2), %v2423_v25  ;;  %v2429_v29 = vld [vmem:[%s3086_s3 + $0x34] ss:$8 sps:$4 sm:$0xff] (!%p388_p2)   ;;  %v2431_v30 = vld [vmem:[%s3086_s3 + $0x30] ss:$8 sps:$4 sm:$0xff] (!%p388_p2)   ;;  %v2177_v43 = vld [vmem:[%s3084_s1] ss:$0 sm:$0xff] (!%p388_p2) }
   0x9   : > { %v2178_v48 = vld [vmem:[%s3085_s2] ss:$0 sm:$0xff] (!%p388_p2)  ;;  %v2690_v58 = vshrl.u32 (!%p388_p2), %v522_v57, 7  ;;  %s2545_s22 = smov (!%p388_p2), 48   ;;  %s2546_s23 = smov (!%p388_p2), 64   ;;  %vm641_vm3 = vcmask (!%p388_p2), 122880  }
   0xa   : > { %v520_v60 = vld [vmem:[%s3087_s4] sm:$0x3] (!%p388_p2)  ;;  %s2547_s24 = smov (!%p388_p2), 32   ;;  %s2548_s28 = smov (!%p388_p2), 112   ;;  %vm1288_vm4 = vcmask (!%p388_p2), 1040384   ;;  %vm1147_vm5 = vcmask (!%p388_p2), 131072  }
   0xb   : > { %581 = vmatpush1.bf16.msra.mxu1 (!%p388_p2), %v2425_v26  ;;  %v524_v59 = vsub.s32 (!%p388_p2), 0, %v2690_v58  ;;  %v528_v61 = vsub.s32 (!%p388_p2), 1, %v2690_v58  ;;  %s2549_s29 = smov (!%p388_p2), 16   ;;  %s2551_s14 = smov (!%p388_p2), 80   ;;  %vm1140_vm6 = vcmask (!%p388_p2), 138240   ;;  %vm1531_vm7 = vcmask (!%p388_p2), 254080  }
   0xc   : > { %582 = vmatprep.subr.bf16.mxu1 (!%p388_p2), %v2426_v27  ;;  %vm1528_vm8 = vcmask (!%p388_p2), 261248   ;;  %vm1548_vm9 = vcmask (!%p388_p2), 385280   ;;  %vm1545_vm10 = vcmask (!%p388_p2), 392448   ;;  %vm1562_vm11 = vcmask (!%p388_p2), 523648  }
   0xd   : > { %s3098_s26 = smov (!%p431_p3, %s2170_s26), 1  ;;  %v525_v62 = vrot.slane %v520_v60, %v524_v59  ;;  %v529_v63 = vrot.slane %v520_v60, %v528_v61  ;;  %vm1565_vm12 = vcmask 516480   ;;  %vm2106_vm13 = vcmask 519168  }
   0xe   : > { %s2403_s27 = smul.u32 12, %s3098_s26  ;;  %vm2110_vm14 = vsmask.f32 256 }
   0xf   : > { %583 = vmatpush1.bf16.msra.mxu1 %v2428_v28  ;;  %vm2111_vm15 = vmand %vm457_vm1, %vm2110_vm14 }
  0x10   : > { %s435_s30 = scalar_lea.vmem %s3083_s0, %s2403_s27  ;;  %584 = vmatprep.subr.bf16.mxu1 %v2429_v29 }
  0x11   : > { %v2250_v0 = vld [vmem:[%s435_s30] sm:$0xff]   ;;  %v444_v1 = vld [vmem:[%s435_s30 + $0x8] sm:$0x1]  ;;  %s2550_s30 = smov 96  }
  0x12   : > { %v2638_v2 = vunpack.c.l.bf16 %v2250_v0  ;;  %v2640_v3 = vunpack.c.l.bf16 %v444_v1  ;;  %v2642_v4 = vunpack.c.h.bf16 %v2250_v0 }
  0x13   : > { %585 = vmatpush1.bf16.msra.mxu1 %v2431_v30 }
  0x14   : > { %v451_v5 = vsel %vm450_vm0, %v2638_v2, 0.0  ;;  %v458_v6 = vsel %vm457_vm1, %v2640_v3, 0.0  ;;  %v454_v7 = vsel %vm450_vm0, %v2642_v4, 0.0 }
  0x15   : > { %452 = vadd.xlane.f32.xlu0 %v451_v5  ;;  %459 = vadd.xlane.f32.xlu1 %v458_v6 }
  0x19   : > { %455 = vadd.xlane.f32.xlu0 %v454_v7 }
  0xa2   : > { %v453_v8 = vpop.xlane.xlu0 %452  ;;  %v460_v9 = vpop.xlane.xlu1 %459 }
  0xa3   : > { %v462_v10 = vmul.f32 0.015625, %v453_v8  ;;  %v464_v11 = vmul.f32 0.015625, %v460_v9 }
  0xa5   : > { %v465_v12 = vsub.f32 %v2638_v2, %v462_v10  ;;  %v467_v13 = vsub.f32 %v2640_v3, %v464_v11 }
  0xa6   : > { %v456_v14 = vpop.xlane.xlu0 %455 }
  0xa7   : > { %v463_v15 = vmul.f32 0.015625, %v456_v14  ;;  %v468_v16 = vmul.f32 %v465_v12, %v465_v12  ;;  %v470_v17 = vmul.f32 %v467_v13, %v467_v13 }
  0xa9   : > { %v466_v18 = vsub.f32 %v2642_v4, %v463_v15  ;;  %v471_v19 = vsel %vm450_vm0, %v468_v16, 0.0  ;;  %v477_v20 = vsel %vm457_vm1, %v470_v17, 0.0 }
  0xaa   : > { %472 = vadd.xlane.f32.xlu1 %v471_v19 }
  0xab   : > { %v469_v21 = vmul.f32 %v466_v18, %v466_v18 }
  0xad   : > { %v474_v22 = vsel %vm450_vm0, %v469_v21, 0.0 }
  0xae   : > { %478 = vadd.xlane.f32.xlu1 %v477_v20  ;;  %475 = vadd.xlane.f32.xlu0 %v474_v22 }
 0x137   : > { %v473_v32 = vpop.xlane.xlu1 %472 }
 0x138   : > { %v480_v33 = vmul.f32 0.015625, %v473_v32 }
 0x13a   : > { %v483_v34 = vadd.f32 1e-06, %v480_v33 }
 0x13b   : > { %v479_v35 = vpop.xlane.xlu1 %478  ;;  %v476_v36 = vpop.xlane.xlu0 %475 }
 0x13c   : > { %2464 = vrsqrt.f32 %v483_v34  ;;  %v482_v37 = vmul.f32 0.015625, %v479_v35  ;;  %v481_v38 = vmul.f32 0.015625, %v476_v36 }
 0x13e   : > { %v485_v39 = vadd.f32 1e-06, %v482_v37  ;;  %v484_v40 = vadd.f32 1e-06, %v481_v38 }
 0x140   : > { %2466 = vrsqrt.f32 %v485_v39 }
 0x141   : > { %2468 = vrsqrt.f32 %v484_v40 }
 0x146   : > { %v2465_v41 = vpop.eup %2464 }
 0x147   : > { %v489_v42 = vmul.f32 %v2465_v41, %v465_v12 }
 0x149   : > { %v498_v47 = vmul.f32 %v2177_v43, %v489_v42 }
 0x14a   : > { %v2467_v44 = vpop.eup %2466 }
 0x14b   : > { %v2469_v45 = vpop.eup %2468  ;;  %v491_v50 = vmul.f32 %v2467_v44, %v467_v13  ;;  %v507_v51 = vadd.f32 %v2178_v48, %v498_v47 }
 0x14c   : > { %v490_v46 = vmul.f32 %v2469_v45, %v466_v18 }
 0x14d   : > { %v500_v54 = vmul.f32 %v2177_v43, %v491_v50 }
 0x14e   : > { %v499_v49 = vmul.f32 %v2177_v43, %v490_v46 }
 0x14f   : > { %v509_v55 = vadd.f32 %v2178_v48, %v500_v54 }
 0x150   : > { %v508_v52 = vadd.f32 %v2178_v48, %v499_v49 }
 0x151   : > { %v511_v56 = vpack.c.bf16 %v509_v55, %v509_v55 }
 0x152   : > { %v510_v53 = vpack.c.bf16 %v508_v52, %v507_v51 }
 0x154   : > { %2187 = vmatmul.mubr.msk.bf16.vlgmr.msra.gmra.mrb[0].mxu1 %vm450_vm0, %v510_v53 }
 0x155   : > { %620 = vmatprep.mubr.bf16.mxu1 %v2544_v31 }
 0x15c   : > { %2188 = vmatmul.mubr.msk.bf16.gmra.mrb[4].mxu1 %vm450_vm0, %v511_v56 }
 0x227   : > { %v612_v0 = vpop.f32.mrb[0].mxu1 }
 0x228   : > { %v613_v1 = vadd.f32 %v612_v0, %v525_v62  ;;  %v614_v5 = vpop.f32.mrb[1].mxu1 }
 0x229   : > { %v615_v6 = vadd.f32 %v614_v5, %v529_v63  ;;  %v616_v7 = vpop.f32.mrb[2].mxu1 }
 0x22a   : > { %639 = vst.msk [vmem:[#allocation3] sm:$0xff] %vm638_vm2, %v613_v1  ;;  %v617_v8 = vadd.f32 %v616_v7, %v525_v62  ;;  %v618_v9 = vpop.f32.mrb[3].mxu1  ;;  %725 = vrot.lane.b32.xlu1 %v613_v1, %s2545_s22  ;;  %706 = vrot.lane.b32.xlu0 %v613_v1, %s2546_s23 }
 0x22b   : > { %630 = vst.msk [vmem:[#allocation2 + $0x8] sm:$0xff] %vm450_vm0, %v615_v6  ;;  %v619_v10 = vadd.f32 %v618_v9, %v529_v63 }
 0x22c   : > { %640 = vst.msk [vmem:[#allocation3 + $0x8] sm:$0xff] %vm638_vm2, %v617_v8 }
 0x22d   : > { %632 = vst.msk [vmem:[#allocation2 + $0x18] sm:$0xff] %vm450_vm0, %v619_v10 }
 0x22e   : > { %708 = vrot.lane.b32.xlu1 %v617_v8, %s2546_s23  ;;  %744 = vrot.lane.b32.xlu0 %v613_v1, %s2547_s24 }
 0x22f   : > { %v622_v11 = vpop.f32.mrb[4].mxu1 }
 0x230   : > { %v623_v12 = vadd.f32 %v622_v11, %v525_v62  ;;  %v624_v13 = vpop.f32.mrb[5].mxu1 }
 0x231   : > { %v625_v14 = vadd.f32 %v624_v13, %v529_v63  ;;  %v626_v15 = vpop.f32.mrb[6].mxu1  ;;  %v840_v18 = vld [vmem:[#allocation3] sm:$0xff] }
 0x232   : > { %v2709_v16 = vld [vmem:[#allocation2 + $0x8] sm:$0xff]  ;;  %633 = vst [vmem:[#allocation2 + $0x20] sm:$0x1] %v623_v12  ;;  %v627_v17 = vpop.f32.mrb[7].mxu1  ;;  %727 = vrot.lane.b32.xlu1 %v617_v8, %s2545_s22 }
 0x233   : > { %780 = vst.msk [vmem:[#allocation3 + $0xc0] sm:$0xff] %vm638_vm2, %v2709_v16  ;;  %v841_v19 = vld [vmem:[#allocation3 + $0x8] sm:$0xff] }
 0x234   : > { %634 = vst.msk [vmem:[#allocation2 + $0x28] sm:$0x1] %vm457_vm1, %v625_v14  ;;  %v2715_v20 = vld [vmem:[#allocation2 + $0x18] sm:$0xff]  ;;  %v852_v21 = vpack.c.bf16 %v841_v19, %v840_v18 }
 0x235   : > { %781 = vst.msk [vmem:[#allocation3 + $0xc8] sm:$0xff] %vm638_vm2, %v2715_v20 }
 0x236   : > { %746 = vrot.lane.b32.xlu1 %v617_v8, %s2547_s24  ;;  %2323 = vmatprep.mubr.msk.bf16.mxu1 %vm638_vm2, %v852_v21 }
 0x239   : > { %v637_v22 = vld [vmem:[#allocation2 + $0x20] sm:$0x1] }
 0x23a   : > { %v702_v23 = vld [vmem:[#allocation2 + $0x20] sm:$0x1]  ;;  %642 = vst.msk [vmem:[#allocation3 + $0x10] sm:$0x1] %vm641_vm3, %v637_v22 }
 0x23b   : > { %v721_v24 = vld [vmem:[#allocation2 + $0x20] sm:$0x1]  ;;  %v778_v25 = vld [vmem:[#allocation2 + $0x28] sm:$0x1]  ;;  %710 = vrot.lane.b32.xlu0 %v702_v23, %s2546_s23 }
 0x23c   : > { %729 = vrot.lane.b32.xlu1 %v721_v24, %s2545_s22  ;;  %782 = vst.msk [vmem:[#allocation3 + $0xd0] sm:$0x1] %vm641_vm3, %v778_v25  ;;  %v645_v26 = vld [vmem:[#allocation2 + $0x20] sm:$0x1]  ;;  %v881_v23 = vld [vmem:[#allocation3 + $0xc8] sm:$0xff] }
 0x23d   : > { %v740_v27 = vld [vmem:[#allocation2 + $0x20] sm:$0x1] }
 0x23e   : > { %v759_v28 = vld [vmem:[#allocation2 + $0x20] sm:$0x1] }
 0x23f   : > { %649 = vrot.lane.b32.xlu0 %v613_v1, %s2548_s28  ;;  %v664_v29 = vld [vmem:[#allocation2 + $0x20] sm:$0x1] }
 0x240   : > { %651 = vrot.lane.b32.xlu1 %v617_v8, %s2548_s28  ;;  %v683_v30 = vld [vmem:[#allocation2 + $0x20] sm:$0x1] }
 0x243   : > { %763 = vrot.lane.b32.xlu0 %v613_v1, %s2549_s29 }
 0x244   : > { %765 = vrot.lane.b32.xlu1 %v617_v8, %s2549_s29 }
 0x247   : > { %653 = vrot.lane.b32.xlu0 %v645_v26, %s2548_s28 }
 0x248   : > { %668 = vrot.lane.b32.xlu1 %v613_v1, %s2550_s30 }
 0x24b   : > { %670 = vrot.lane.b32.xlu0 %v617_v8, %s2550_s30 }
 0x24c   : > { %748 = vrot.lane.b32.xlu1 %v740_v27, %s2547_s24 }
 0x24f   : > { %767 = vrot.lane.b32.xlu0 %v759_v28, %s2549_s29 }
 0x250   : > { %672 = vrot.lane.b32.xlu1 %v664_v29, %s2550_s30 }
 0x253   : > { %687 = vrot.lane.b32.xlu0 %v613_v1, %s2551_s14 }
 0x254   : > { %689 = vrot.lane.b32.xlu1 %v617_v8, %s2551_s14  ;;  %v842_v8 = vld [vmem:[#allocation3 + $0x10] sm:$0x1] }
 0x255   : > { %v853_v13 = vpack.c.bf16 %v842_v8, %v842_v8 }
 0x257   : > { %691 = vrot.lane.b32.xlu0 %v683_v30, %s2551_s14 }
 0x258   : > { %789 = vrot.lane.b32.xlu1 %v2709_v16, %s2548_s28 }
 0x29c   : > { %v726_v32 = vpop.permute.xlu1 %725  ;;  %v707_v33 = vpop.permute.xlu0 %706 }
 0x29d   : > { %735 = vst.msk [vmem:[#allocation3 + $0x78] sm:$0xff] %vm638_vm2, %v726_v32  ;;  %716 = vst.msk [vmem:[#allocation3 + $0x60] sm:$0xff] %vm638_vm2, %v707_v33  ;;  %v880_v32 = vld [vmem:[#allocation3 + $0xc0] sm:$0xff] }
 0x2a0   : > { %v709_v34 = vpop.permute.xlu1 %708  ;;  %v745_v35 = vpop.permute.xlu0 %744 }
 0x2a1   : > { %717 = vst.msk [vmem:[#allocation3 + $0x68] sm:$0xff] %vm638_vm2, %v709_v34  ;;  %754 = vst.msk [vmem:[#allocation3 + $0x90] sm:$0xff] %vm638_vm2, %v745_v35  ;;  %v892_v34 = vpack.c.bf16 %v881_v23, %v880_v32 }
 0x2a4   : > { %v728_v36 = vpop.permute.xlu1 %727  ;;  %v860_v38 = vld [vmem:[#allocation3 + $0x60] sm:$0xff]  ;;  %v863_v44 = vld [vmem:[#allocation3 + $0x78] sm:$0xff] }
 0x2a5   : > { %736 = vst.msk [vmem:[#allocation3 + $0x80] sm:$0xff] %vm638_vm2, %v728_v36 }
 0x2a8   : > { %v747_v37 = vpop.permute.xlu1 %746  ;;  %v861_v39 = vld [vmem:[#allocation3 + $0x68] sm:$0xff]  ;;  %v866_v57 = vld [vmem:[#allocation3 + $0x90] sm:$0xff] }
 0x2a9   : > { %755 = vst.msk [vmem:[#allocation3 + $0x98] sm:$0xff] %vm638_vm2, %v747_v37  ;;  %v872_v40 = vpack.c.bf16 %v861_v39, %v860_v38  ;;  %v882_v38 = vld [vmem:[#allocation3 + $0xd0] sm:$0x1] }
 0x2ab   : > { %2395 = vmatprep.subr.msk.bf16.mxu1 %vm638_vm2, %v872_v40  ;;  %v907_v41 = vsel %vm638_vm2, %v872_v40, 0 }
 0x2ac   : > { %2320 = vmatpush3.bf16.xpose.msra.mxu1 %v907_v41  ;;  %v864_v45 = vld [vmem:[#allocation3 + $0x80] sm:$0xff] }
 0x2ad   : > { %v711_v42 = vpop.permute.xlu0 %710  ;;  %v874_v46 = vpack.c.bf16 %v864_v45, %v863_v44  ;;  %v2783_v45 = vsel %vm1288_vm4, 65535, %v2544_v31 }
 0x2ae   : > { %v730_v43 = vpop.permute.xlu1 %729  ;;  %718 = vst.msk [vmem:[#allocation3 + $0x70] sm:$0x1] %vm641_vm3, %v711_v42  ;;  %v893_v42 = vpack.c.bf16 %v882_v38, %v882_v38 }
 0x2af   : > { %737 = vst.msk [vmem:[#allocation3 + $0x88] sm:$0x1] %vm641_vm3, %v730_v43  ;;  %2397 = vmatprep.subr.msk.bf16.mxu0 %vm638_vm2, %v874_v46  ;;  %v967_v47 = vsel %vm638_vm2, %v874_v46, 0 }
 0x2b0   : > { %2328 = vmatpush3.bf16.xpose.msra.mxu0 %v967_v47  ;;  %v867_v53 = vld [vmem:[#allocation3 + $0x98] sm:$0xff] }
 0x2b1   : > { %v650_v48 = vpop.permute.xlu0 %649  ;;  %v876_v62 = vpack.c.bf16 %v867_v53, %v866_v57 }
 0x2b2   : > { %v652_v49 = vpop.permute.xlu1 %651  ;;  %659 = vst.msk [vmem:[#allocation3 + $0x18] sm:$0xff] %vm638_vm2, %v650_v48  ;;  %v1292_v48 = vand.u32 %v2783_v45, %v893_v42 }
 0x2b3   : > { %660 = vst.msk [vmem:[#allocation3 + $0x20] sm:$0xff] %vm638_vm2, %v652_v49  ;;  %v1027_v15 = vsel %vm638_vm2, %v876_v62, 0 }
 0x2b5   : > { %v764_v50 = vpop.permute.xlu0 %763  ;;  %v862_v51 = vld [vmem:[#allocation3 + $0x70] sm:$0x1] }
 0x2b6   : > { %v766_v52 = vpop.permute.xlu1 %765  ;;  %v865_v54 = vld [vmem:[#allocation3 + $0x88] sm:$0x1]  ;;  %773 = vst.msk [vmem:[#allocation3 + $0xa8] sm:$0xff] %vm638_vm2, %v764_v50  ;;  %v873_v55 = vpack.c.bf16 %v862_v51, %v862_v51 }
 0x2b7   : > { %774 = vst.msk [vmem:[#allocation3 + $0xb0] sm:$0xff] %vm638_vm2, %v766_v52  ;;  %v875_v56 = vpack.c.bf16 %v865_v54, %v865_v54 }
 0x2b8   : > { %2396 = vmatprep.subr.msk.bf16.mxu1 %vm638_vm2, %v873_v55  ;;  %v910_v60 = vsel %vm638_vm2, %v873_v55, 0 }
 0x2b9   : > { %2398 = vmatprep.subr.msk.bf16.mxu0 %vm638_vm2, %v875_v56  ;;  %v970_v63 = vsel %vm638_vm2, %v875_v56, 0  ;;  %v654_v0 = vpop.permute.xlu0 %653  ;;  %2322 = vmatpush3.bf16.xpose.msra.mxu1 %v910_v60  ;;  %v843_v5 = vld [vmem:[#allocation3 + $0x18] sm:$0xff] }
 0x2ba   : > { %2330 = vmatpush3.bf16.xpose.msra.mxu0 %v970_v63  ;;  %v669_v1 = vpop.permute.xlu1 %668  ;;  %v844_v6 = vld [vmem:[#allocation3 + $0x20] sm:$0xff]  ;;  %661 = vst.msk [vmem:[#allocation3 + $0x28] sm:$0x1] %vm641_vm3, %v654_v0  ;;  %2399 = vmatprep.subr.msk.bf16.mxu1 %vm638_vm2, %v876_v62 }
 0x2bb   : > { %678 = vst.msk [vmem:[#allocation3 + $0x30] sm:$0xff] %vm638_vm2, %v669_v1  ;;  %v854_v7 = vpack.c.bf16 %v844_v6, %v843_v5 }
 0x2bd   : > { %2331 = vmatprep.mubr.msk.bf16.mxu0 %vm638_vm2, %v854_v7  ;;  %v671_v9 = vpop.permute.xlu0 %670  ;;  %v869_v11 = vld [vmem:[#allocation3 + $0xa8] sm:$0xff] }
 0x2be   : > { %v749_v10 = vpop.permute.xlu1 %748  ;;  %v870_v12 = vld [vmem:[#allocation3 + $0xb0] sm:$0xff]  ;;  %679 = vst.msk [vmem:[#allocation3 + $0x38] sm:$0xff] %vm638_vm2, %v671_v9  ;;  %v785_v9 = vld [vmem:[#allocation2 + $0x28] sm:$0x1] }
 0x2bf   : > { %756 = vst.msk [vmem:[#allocation3 + $0xa0] sm:$0x1] %vm641_vm3, %v749_v10  ;;  %v878_v14 = vpack.c.bf16 %v870_v12, %v869_v11 }
 0x2c0   : > { %2324 = vmatmul.mubr.msk.bf16.vlgmr.msra.gmra.mrb[8].mxu1 %vm638_vm2, %v853_v13 }
 0x2c1   : > { %2401 = vmatprep.subr.msk.bf16.mxu0 %vm638_vm2, %v878_v14  ;;  %v768_v17 = vpop.permute.xlu0 %767  ;;  %2336 = vmatpush3.bf16.xpose.msra.mxu1 %v1027_v15  ;;  %v845_v18 = vld [vmem:[#allocation3 + $0x28] sm:$0x1]  ;;  %v1087_v22 = vsel %vm638_vm2, %v878_v14, 0 }
 0x2c2   : > { %v673_v19 = vpop.permute.xlu1 %672  ;;  %775 = vst.msk [vmem:[#allocation3 + $0xb8] sm:$0x1] %vm641_vm3, %v768_v17  ;;  %v855_v21 = vpack.c.bf16 %v845_v18, %v845_v18  ;;  %v846_v25 = vld [vmem:[#allocation3 + $0x30] sm:$0xff] }
 0x2c3   : > { %680 = vst.msk [vmem:[#allocation3 + $0x40] sm:$0x1] %vm641_vm3, %v673_v19 }
 0x2c4   : > { %2332 = vmatmul.mubr.msk.bf16.vlgmr.msra.gmra.mrb[0].mxu0 %vm638_vm2, %v855_v21 }
 0x2c5   : > { %v688_v24 = vpop.permute.xlu0 %687  ;;  %2344 = vmatpush3.bf16.xpose.msra.mxu0 %v1087_v22  ;;  %v847_v26 = vld [vmem:[#allocation3 + $0x38] sm:$0xff] }
 0x2c6   : > { %v690_v27 = vpop.permute.xlu1 %689  ;;  %v868_v28 = vld [vmem:[#allocation3 + $0xa0] sm:$0x1]  ;;  %697 = vst.msk [vmem:[#allocation3 + $0x48] sm:$0xff] %vm638_vm2, %v688_v24  ;;  %v856_v29 = vpack.c.bf16 %v847_v26, %v846_v25 }
 0x2c7   : > { %698 = vst.msk [vmem:[#allocation3 + $0x50] sm:$0xff] %vm638_vm2, %v690_v27  ;;  %v877_v30 = vpack.c.bf16 %v868_v28, %v868_v28 }
 0x2c8   : > { %2339 = vmatprep.mubr.msk.bf16.mxu1 %vm638_vm2, %v856_v29 }
 0x2c9   : > { %2400 = vmatprep.subr.msk.bf16.mxu1 %vm638_vm2, %v877_v30  ;;  %v1030_v33 = vsel %vm638_vm2, %v877_v30, 0  ;;  %v692_v35 = vpop.permute.xlu0 %691  ;;  %v871_v36 = vld [vmem:[#allocation3 + $0xb8] sm:$0x1] }
 0x2ca   : > { %v790_v37 = vpop.permute.xlu1 %789  ;;  %2338 = vmatpush3.bf16.xpose.msra.mxu1 %v1030_v33  ;;  %699 = vst.msk [vmem:[#allocation3 + $0x58] sm:$0x1] %vm641_vm3, %v692_v35  ;;  %v879_v39 = vpack.c.bf16 %v871_v36, %v871_v36  ;;  %v848_v40 = vld [vmem:[#allocation3 + $0x40] sm:$0x1] }
 0x2cb   : > { %799 = vst.msk [vmem:[#allocation3 + $0xd8] sm:$0xff] %vm638_vm2, %v790_v37  ;;  %2351 = vmatprep.subr.bf16.mxu1 %v892_v34  ;;  %v857_v46 = vpack.c.bf16 %v848_v40, %v848_v40 }
 0x2cc   : > { %2402 = vmatprep.subr.msk.bf16.mxu0 %vm638_vm2, %v879_v39  ;;  %v1090_v41 = vsel %vm638_vm2, %v879_v39, 0 }
 0x2cd   : > { %2346 = vmatpush3.bf16.xpose.msra.mxu0 %v1090_v41  ;;  %v849_v43 = vld [vmem:[#allocation3 + $0x48] sm:$0xff] }
 0x2ce   : > { %v850_v44 = vld [vmem:[#allocation3 + $0x50] sm:$0xff] }
 0x2cf   : > { %v858_v47 = vpack.c.bf16 %v850_v44, %v849_v43 }
 0x2d1   : > { %2340 = vmatmul.mubr.msk.bf16.vlgmr.msra.gmra.mrb[12].mxu1 %vm638_vm2, %v857_v46  ;;  %2347 = vmatprep.mubr.msk.bf16.mxu0 %vm638_vm2, %v858_v47  ;;  %v851_v49 = vld [vmem:[#allocation3 + $0x58] sm:$0x1] }
 0x2d2   : > { %2352 = vmatpush3.bf16.msra.mxu1 %v892_v34  ;;  %v859_v50 = vpack.c.bf16 %v851_v49, %v851_v49 }
 0x2d3   : > { %2353 = vmatprep.subr.bf16.mxu1 %v1292_v48 }
 0x2d4   : > { %2348 = vmatmul.mubr.msk.bf16.vlgmr.msra.gmra.mrb[4].mxu0 %vm638_vm2, %v859_v50 }
 0x2d6   : > { %2354 = vmatpush3.bf16.msra.mxu1 %v1292_v48 }
 0x393   : > { %v2325_v51 = vpop.f32.mrb[8].mxu1 }
 0x394   : > { %v946_v52 = vpop.f32.mrb[9].mxu1  ;;  %v1148_v53 = vsel %vm1147_vm5, %v2325_v51, -inf }
 0x395   : > { %1149 = vmax.xlane.f32.xlu0 %v1148_v53  ;;  %v2326_v54 = vpop.f32.mrb[10].mxu1  ;;  %v1141_v55 = vsel %vm1140_vm6, %v946_v52, -inf }
 0x396   : > { %1142 = vmax.xlane.f32.xlu1 %v1141_v55  ;;  %v2791_v56 = vpop.f32.mrb[11].mxu1  ;;  %v883_v54 = vld [vmem:[#allocation3 + $0xd8] sm:$0xff] }
 0x397   : > { %v2333_v57 = vpop.f32.mrb[0].mxu0  ;;  %v1144_v5 = vsel %vm1140_vm6, %v2791_v56, -inf }
 0x398   : > { %v1006_v60 = vpop.f32.mrb[1].mxu0  ;;  %v1157_v62 = vsel %vm1147_vm5, %v2333_v57, -inf }
 0x399   : > { %v2334_v63 = vpop.f32.mrb[2].mxu0  ;;  %1158 = vmax.xlane.f32.xlu0 %v1157_v62  ;;  %v1151_v1 = vsel %vm1140_vm6, %v1006_v60, -inf }
 0x39a   : > { %v2794_v0 = vpop.f32.mrb[3].mxu0 }
 0x39b   : > { %v1154_v15 = vsel %vm1140_vm6, %v2794_v0, -inf }
 0x39d   : > { %1152 = vmax.xlane.f32.xlu0 %v1151_v1 }
 0x3a1   : > { %1145 = vmax.xlane.f32.xlu0 %v1144_v5 }
 0x3a4   : > { %v2799_v6 = vpop.f32.mrb[12].mxu1 }
 0x3a5   : > { %v2801_v7 = vpop.f32.mrb[13].mxu1  ;;  %v1166_v18 = vsel %vm1147_vm5, %v2799_v6, -inf }
 0x3a6   : > { %v2342_v8 = vpop.f32.mrb[14].mxu1  ;;  %v1160_v21 = vsel %vm1140_vm6, %v2801_v7, -inf }
 0x3a7   : > { %v2803_v10 = vpop.f32.mrb[15].mxu1  ;;  %793 = vrot.lane.b32.xlu1 %v785_v9, %s2548_s28  ;;  %v2806_v11 = vpop.f32.mrb[4].mxu0 }
 0x3a8   : > { %v2808_v12 = vpop.f32.mrb[5].mxu0  ;;  %v1175_v17 = vsel %vm1147_vm5, %v2806_v11, -inf  ;;  %v1163_v22 = vsel %vm1140_vm6, %v2803_v10, -inf }
 0x3a9   : > { %v2350_v13 = vpop.f32.mrb[6].mxu0  ;;  %v1169_v19 = vsel %vm1140_vm6, %v2808_v12, -inf }
 0x3aa   : > { %v2810_v14 = vpop.f32.mrb[7].mxu0 }
 0x3ab   : > { %808 = vrot.lane.b32.xlu1 %v2709_v16, %s2550_s30  ;;  %v1172_v23 = vsel %vm1140_vm6, %v2810_v14, -inf }
 0x3af   : > { %810 = vrot.lane.b32.xlu1 %v2715_v20, %s2550_s30 }
 0x3b7   : > { %791 = vrot.lane.b32.xlu0 %v2715_v20, %s2548_s28 }
 0x3d3   : > { %1155 = vmax.xlane.f32.xlu1 %v1154_v15 }
 0x3d6   : > { %1176 = vmax.xlane.f32.xlu0 %v1175_v17 }
 0x3d7   : > { %1167 = vmax.xlane.f32.xlu1 %v1166_v18 }
 0x3da   : > { %1170 = vmax.xlane.f32.xlu0 %v1169_v19 }
 0x3db   : > { %1161 = vmax.xlane.f32.xlu1 %v1160_v21 }
 0x3de   : > { %1164 = vmax.xlane.f32.xlu0 %v1163_v22 }
 0x3df   : > { %1173 = vmax.xlane.f32.xlu1 %v1172_v23 }
 0x3f0   : > { %829 = vrot.lane.b32.xlu1 %v2715_v20, %s2551_s14 }
 0x3f4   : > { %827 = vrot.lane.b32.xlu0 %v2709_v16, %s2551_s14 }
 0x422   : > { %v1150_v24 = vpop.xlane.xlu0 %1149 }
 0x423   : > { %v1180_v25 = vsub.f32 %v2325_v51, %v1150_v24  ;;  %v1143_v26 = vpop.xlane.xlu1 %1142 }
 0x424   : > { %v1178_v27 = vsub.f32 %v946_v52, %v1143_v26 }
 0x425   : > { %v1194_v28 = vmul.f32 1.442695, %v1180_v25 }
 0x426   : > { %v1190_v29 = vmul.f32 1.442695, %v1178_v27  ;;  %v1159_v30 = vpop.xlane.xlu0 %1158 }
 0x427   : > { %2470 = vpow2.f32 %v1194_v28  ;;  %v1183_v32 = vsub.f32 %v2333_v57, %v1159_v30  ;;  %v794_v33 = vpop.permute.xlu1 %793 }
 0x428   : > { %801 = vst.msk [vmem:[#allocation3 + $0xe8] sm:$0x1] %vm641_vm3, %v794_v33  ;;  %2472 = vpow2.f32 %v1190_v29 }
 0x429   : > { %v1200_v34 = vmul.f32 1.442695, %v1183_v32 }
 0x42a   : > { %v1153_v35 = vpop.xlane.xlu0 %1152 }
 0x42b   : > { %2474 = vpow2.f32 %v1200_v34  ;;  %v1181_v20 = vsub.f32 %v1006_v60, %v1153_v35  ;;  %v809_v36 = vpop.permute.xlu1 %808 }
 0x42c   : > { %818 = vst.msk [vmem:[#allocation3 + $0xf0] sm:$0xff] %vm638_vm2, %v809_v36 }
 0x42d   : > { %v1196_v16 = vmul.f32 1.442695, %v1181_v20 }
 0x42e   : > { %v1146_v37 = vpop.xlane.xlu0 %1145 }
 0x42f   : > { %2476 = vpow2.f32 %v1196_v16  ;;  %v1179_v38 = vsub.f32 %v2791_v56, %v1146_v37  ;;  %v811_v39 = vpop.permute.xlu1 %810 }
 0x430   : > { %819 = vst.msk [vmem:[#allocation3 + $0xf8] sm:$0xff] %vm638_vm2, %v811_v39  ;;  %v823_v39 = vld [vmem:[#allocation2 + $0x28] sm:$0x1] }
 0x431   : > { %v2840_v40 = vpop.eup %2470  ;;  %v1192_v41 = vmul.f32 1.442695, %v1179_v38 }
 0x432   : > { %v792_v42 = vpop.permute.xlu0 %791  ;;  %v1220_v43 = vsel %vm1147_vm5, %v2840_v40, 0.0  ;;  %v2844_v44 = vpop.eup %2472 }
 0x433   : > { %2478 = vpow2.f32 %v1192_v41  ;;  %800 = vst.msk [vmem:[#allocation3 + $0xe0] sm:$0xff] %vm638_vm2, %v792_v42  ;;  %1221 = vadd.xlane.f32.xlu1 %v1220_v43  ;;  %v1214_v47 = vsel %vm1140_vm6, %v2844_v44, 0.0  ;;  %v886_v49 = vld [vmem:[#allocation3 + $0xf0] sm:$0xff]  ;;  %v804_v41 = vld [vmem:[#allocation2 + $0x28] sm:$0x1] }
 0x435   : > { %v2847_v46 = vpop.eup %2474 }
 0x436   : > { %v1229_v48 = vsel %vm1147_vm5, %v2847_v46, 0.0 }
 0x437   : > { %1215 = vadd.xlane.f32.xlu1 %v1214_v47  ;;  %1230 = vadd.xlane.f32.xlu0 %v1229_v48  ;;  %v887_v50 = vld [vmem:[#allocation3 + $0xf8] sm:$0xff] }
 0x438   : > { %v896_v51 = vpack.c.bf16 %v887_v50, %v886_v49 }
 0x439   : > { %v2853_v52 = vpop.eup %2476 }
 0x43a   : > { %2367 = vmatprep.subr.bf16.mxu0 %v896_v51  ;;  %v1223_v53 = vsel %vm1140_vm6, %v2853_v52, 0.0  ;;  %v884_v55 = vld [vmem:[#allocation3 + $0xe0] sm:$0xff] }
 0x43b   : > { %2368 = vmatpush3.bf16.msra.mxu0 %v896_v51  ;;  %1224 = vadd.xlane.f32.xlu0 %v1223_v53  ;;  %v2857_v56 = vpack.c.bf16 %v884_v55, %v883_v54  ;;  %v885_v53 = vld [vmem:[#allocation3 + $0xe8] sm:$0x1] }
 0x43d   : > { %v2859_v57 = vpop.eup %2478  ;;  %2359 = vmatprep.subr.bf16.mxu1 %v2857_v56 }
 0x43e   : > { %v1217_v60 = vsel %vm1140_vm6, %v2859_v57, 0.0 }
 0x43f   : > { %1218 = vadd.xlane.f32.xlu0 %v1217_v60 }
 0x460   : > { %v1156_v62 = vpop.xlane.xlu1 %1155 }
 0x461   : > { %v1182_v63 = vsub.f32 %v2794_v0, %v1156_v62 }
 0x463   : > { %v1198_v1 = vmul.f32 1.442695, %v1182_v63  ;;  %v1177_v5 = vpop.xlane.xlu0 %1176  ;;  %v895_v63 = vpack.c.bf16 %v885_v53, %v885_v53 }
 0x464   : > { %v1189_v8 = vsub.f32 %v2806_v11, %v1177_v5  ;;  %v1168_v9 = vpop.xlane.xlu1 %1167 }
 0x465   : > { %2480 = vpow2.f32 %v1198_v1  ;;  %v1186_v13 = vsub.f32 %v2799_v6, %v1168_v9 }
 0x466   : > { %v1212_v15 = vmul.f32 1.442695, %v1189_v8  ;;  %v1349_v8 = vand.u32 %v2783_v45, %v895_v63 }
 0x467   : > { %v1206_v17 = vmul.f32 1.442695, %v1186_v13  ;;  %v1171_v18 = vpop.xlane.xlu0 %1170 }
 0x468   : > { %2482 = vpow2.f32 %v1212_v15  ;;  %v1187_v19 = vsub.f32 %v2808_v12, %v1171_v18  ;;  %v1162_v21 = vpop.xlane.xlu1 %1161 }
 0x469   : > { %2484 = vpow2.f32 %v1206_v17  ;;  %v1184_v22 = vsub.f32 %v2801_v7, %v1162_v21 }
 0x46a   : > { %v1208_v23 = vmul.f32 1.442695, %v1187_v19 }
 0x46b   : > { %v1202_v0 = vmul.f32 1.442695, %v1184_v22  ;;  %v1165_v24 = vpop.xlane.xlu0 %1164 }
 0x46c   : > { %2486 = vpow2.f32 %v1208_v23  ;;  %v1185_v11 = vsub.f32 %v2803_v10, %v1165_v24  ;;  %v1174_v25 = vpop.xlane.xlu1 %1173 }
 0x46d   : > { %2488 = vpow2.f32 %v1202_v0  ;;  %v1188_v6 = vsub.f32 %v2810_v14, %v1174_v25 }
 0x46e   : > { %v1204_v26 = vmul.f32 1.442695, %v1185_v11 }
 0x46f   : > { %v2871_v27 = vpop.eup %2480  ;;  %v1210_v28 = vmul.f32 1.442695, %v1188_v6  ;;  %v828_v29 = vpop.permute.xlu0 %827 }
 0x470   : > { %2490 = vpow2.f32 %v1204_v26  ;;  %837 = vst.msk [vmem:[#allocation3 + $0x108] sm:$0xff] %vm638_vm2, %v828_v29  ;;  %v830_v12 = vpop.permute.xlu1 %829  ;;  %v1226_v7 = vsel %vm1140_vm6, %v2871_v27, 0.0 }
 0x471   : > { %2492 = vpow2.f32 %v1210_v28  ;;  %838 = vst.msk [vmem:[#allocation3 + $0x110] sm:$0xff] %vm638_vm2, %v830_v12  ;;  %1227 = vadd.xlane.f32.xlu1 %v1226_v7 }
 0x472   : > { %v2877_v10 = vpop.eup %2482 }
 0x473   : > { %v2879_v30 = vpop.eup %2484  ;;  %v1247_v14 = vsel %vm1147_vm5, %v2877_v10, 0.0 }
 0x474   : > { %1248 = vadd.xlane.f32.xlu0 %v1247_v14  ;;  %v1238_v32 = vsel %vm1147_vm5, %v2879_v30, 0.0 }
 0x475   : > { %1239 = vadd.xlane.f32.xlu1 %v1238_v32 }
 0x476   : > { %v2885_v33 = vpop.eup %2486 }
 0x477   : > { %v2887_v34 = vpop.eup %2488  ;;  %v1241_v35 = vsel %vm1140_vm6, %v2885_v33, 0.0  ;;  %v889_v9 = vld [vmem:[#allocation3 + $0x108] sm:$0xff] }
 0x478   : > { %1242 = vadd.xlane.f32.xlu0 %v1241_v35  ;;  %v1232_v20 = vsel %vm1140_vm6, %v2887_v34, 0.0  ;;  %v890_v13 = vld [vmem:[#allocation3 + $0x110] sm:$0xff] }
 0x479   : > { %1233 = vadd.xlane.f32.xlu1 %v1232_v20  ;;  %v898_v15 = vpack.c.bf16 %v890_v13, %v889_v9 }
 0x47a   : > { %v2893_v36 = vpop.eup %2490 }
 0x47b   : > { %v2895_v16 = vpop.eup %2492  ;;  %v1235_v37 = vsel %vm1140_vm6, %v2893_v36, 0.0 }
 0x47c   : > { %1236 = vadd.xlane.f32.xlu0 %v1235_v37  ;;  %v1244_v38 = vsel %vm1140_vm6, %v2895_v16, 0.0 }
 0x47d   : > { %1245 = vadd.xlane.f32.xlu1 %v1244_v38 }
 0x48e   : > { %831 = vrot.lane.b32.xlu1 %v823_v39, %s2551_s14 }
 0x492   : > { %812 = vrot.lane.b32.xlu0 %v804_v41, %s2550_s30  ;;  %s440_s30 = scalar_lea.vmem %s3096_s13, %s2403_s27 }
 0x4c0   : > { %v1222_v42 = vpop.xlane.xlu1 %1221 }
 0x4c1   : > { %2494 = vrcp.f32 %v1222_v42 }
 0x4c4   : > { %v1231_v43 = vpop.xlane.xlu0 %1230  ;;  %v1216_v47 = vpop.xlane.xlu1 %1215 }
 0x4c5   : > { %2496 = vrcp.f32 %v1216_v47 }
 0x4c8   : > { %v1225_v48 = vpop.xlane.xlu0 %1224 }
 0x4cb   : > { %v2495_v50 = vpop.eup %2494 }
 0x4cc   : > { %v1219_v49 = vpop.xlane.xlu0 %1218  ;;  %v1264_v55 = vmul.f32 %v2495_v50, %v2840_v40 }
 0x4cd   : > { %2498 = vrcp.f32 %v1219_v49 }
 0x4ce   : > { %v1275_v5 = vpack.c.bf16 %v1264_v55, %v1264_v55  ;;  %2500 = vrcp.f32 %v1231_v43  ;;  %v2432_v55 = vld [vmem:[%s3088_s5] sm:$0xff]  }
 0x4cf   : > { %v2497_v51 = vpop.eup %2496  ;;  %2502 = vrcp.f32 %v1225_v48 }
 0x4d0   : > { %v1262_v60 = vmul.f32 %v2497_v51, %v2844_v44 }
 0x4d7   : > { %v2499_v54 = vpop.eup %2498 }
 0x4d8   : > { %v1263_v62 = vmul.f32 %v2499_v54, %v2859_v57  ;;  %v2501_v18 = vpop.eup %2500 }
 0x4d9   : > { %v2503_v21 = vpop.eup %2502 }
 0x4da   : > { %v1274_v1 = vpack.c.bf16 %v1263_v62, %v1262_v60  ;;  %v1265_v24 = vmul.f32 %v2503_v21, %v2853_v52  ;;  %v2433_v60 = vld [vmem:[%s3088_s5 + $0x8] sm:$0xff]   ;;  %v2434_v62 = vld [vmem:[%s3088_s5 + $0x10] sm:$0xff]  }
 0x4dc   : > { %2355 = vmatprep.mubr.msk.bf16.mxu1 %vm1140_vm6, %v1274_v1 }
 0x4dd   : > { %2356 = vmatmul.mubr.msk.bf16.vlgmr.msra.gmra.mrb[16].mxu1 %vm1140_vm6, %v1275_v5 }
 0x4de   : > { %2360 = vmatpush3.bf16.msra.mxu1 %v2857_v56  ;;  %v1267_v56 = vmul.f32 %v2501_v18, %v2847_v46 }
 0x4df   : > { %2361 = vmatprep.subr.bf16.mxu1 %v1349_v8 }
 0x4e0   : > { %v1277_v26 = vpack.c.bf16 %v1267_v56, %v1267_v56 }
 0x4e2   : > { %2362 = vmatpush3.bf16.msra.mxu1 %v1349_v8  ;;  %v2435_v8 = vld [vmem:[%s3088_s5 + $0x18] sm:$0xff]  }
 0x4e3   : > { %2375 = vmatprep.subr.bf16.mxu1 %v898_v15 }
 0x4fe   : > { %v1228_v40 = vpop.xlane.xlu1 %1227 }
 0x4ff   : > { %2504 = vrcp.f32 %v1228_v40 }
 0x501   : > { %v1249_v44 = vpop.xlane.xlu0 %1248 }
 0x502   : > { %v1240_v57 = vpop.xlane.xlu1 %1239 }
 0x503   : > { %2506 = vrcp.f32 %v1240_v57 }
 0x505   : > { %v1243_v17 = vpop.xlane.xlu0 %1242 }
 0x506   : > { %v1234_v19 = vpop.xlane.xlu1 %1233 }
 0x507   : > { %2508 = vrcp.f32 %v1234_v19 }
 0x508   : > { %2510 = vrcp.f32 %v1243_v17 }
 0x509   : > { %v2505_v22 = vpop.eup %2504  ;;  %v1237_v23 = vpop.xlane.xlu0 %1236 }
 0x50a   : > { %2512 = vrcp.f32 %v1237_v23  ;;  %v1246_v0 = vpop.xlane.xlu1 %1245  ;;  %v1266_v11 = vmul.f32 %v2505_v22, %v2871_v27 }
 0x50b   : > { %2514 = vrcp.f32 %v1246_v0 }
 0x50c   : > { %2516 = vrcp.f32 %v1249_v44  ;;  %v1276_v25 = vpack.c.bf16 %v1266_v11, %v1265_v24 }
 0x50d   : > { %v813_v6 = vpop.permute.xlu0 %812  ;;  %v2507_v46 = vpop.eup %2506 }
 0x50e   : > { %820 = vst.msk [vmem:[#allocation3 + $0x100] sm:$0x1] %vm641_vm3, %v813_v6  ;;  %v832_v28 = vpop.permute.xlu1 %831  ;;  %2363 = vmatprep.mubr.msk.bf16.mxu1 %vm1140_vm6, %v1276_v25  ;;  %v1270_v43 = vmul.f32 %v2507_v46, %v2879_v30  ;;  %v2211_v46 = vld [vmem:[%s3089_s6] ss:$0 sm:$0xff] }
 0x50f   : > { %839 = vst.msk [vmem:[#allocation3 + $0x118] sm:$0x1] %vm641_vm3, %v832_v28  ;;  %2364 = vmatmul.mubr.msk.bf16.vlgmr.msra.gmra.mrb[20].mxu1 %vm1140_vm6, %v1277_v26 }
 0x510   : > { %2376 = vmatpush3.bf16.msra.mxu1 %v898_v15 }
 0x511   : > { %v2509_v29 = vpop.eup %2508 }
 0x512   : > { %v2511_v52 = vpop.eup %2510  ;;  %v1268_v7 = vmul.f32 %v2509_v29, %v2887_v34 }
 0x513   : > { %v1271_v37 = vmul.f32 %v2511_v52, %v2885_v33  ;;  %v1279_v33 = vpack.c.bf16 %v1270_v43, %v1270_v43 }
 0x514   : > { %v2513_v12 = vpop.eup %2512 }
 0x515   : > { %v2515_v27 = vpop.eup %2514  ;;  %v1269_v14 = vmul.f32 %v2513_v12, %v2893_v36  ;;  %v888_v32 = vld [vmem:[#allocation3 + $0x100] sm:$0x1] }
 0x516   : > { %v2517_v35 = vpop.eup %2516  ;;  %v897_v20 = vpack.c.bf16 %v888_v32, %v888_v32  ;;  %v1272_v38 = vmul.f32 %v2515_v27, %v2895_v16  ;;  %v891_v39 = vld [vmem:[#allocation3 + $0x118] sm:$0x1] }
 0x517   : > { %v1278_v41 = vpack.c.bf16 %v1269_v14, %v1268_v7  ;;  %v899_v42 = vpack.c.bf16 %v891_v39, %v891_v39  ;;  %v1273_v49 = vmul.f32 %v2517_v35, %v2877_v10 }
 0x518   : > { %v1406_v47 = vand.u32 %v2783_v45, %v897_v20  ;;  %v1280_v48 = vpack.c.bf16 %v1272_v38, %v1271_v37 }
 0x519   : > { %2371 = vmatprep.mubr.msk.bf16.mxu0 %vm1140_vm6, %v1278_v41  ;;  %v1463_v34 = vand.u32 %v2783_v45, %v899_v42  ;;  %v1281_v36 = vpack.c.bf16 %v1273_v49, %v1273_v49 }
 0x51a   : > { %2369 = vmatprep.subr.bf16.mxu0 %v1406_v47  ;;  %2379 = vmatprep.mubr.msk.bf16.mxu1 %vm1140_vm6, %v1280_v48 }
 0x51b   : > { %2370 = vmatpush3.bf16.msra.mxu0 %v1406_v47  ;;  %2377 = vmatprep.subr.bf16.mxu1 %v1463_v34 }
 0x51c   : > { %2378 = vmatpush3.bf16.msra.mxu1 %v1463_v34  ;;  %2383 = vmatprep.subr.bf16.mxu0 %v2432_v55 }
 0x51e   : > { %2372 = vmatmul.mubr.msk.bf16.vlgmr.msra.gmra.mrb[8].mxu0 %vm1140_vm6, %v1279_v33 }
 0x51f   : > { %2380 = vmatmul.mubr.msk.bf16.vlgmr.msra.gmra.mrb[24].mxu1 %vm1140_vm6, %v1281_v36  ;;  %2384 = vmatpush3.bf16.msra.mxu0 %v2432_v55  ;;  %v2442_v55 = vld [vmem:[%s3092_s9 + $0x20] ss:$8 sps:$4 sm:$0xff]  }
 0x520   : > { %1830 = vmatprep.mubr.bf16.mxu1 %v2544_v31  ;;  %2385 = vmatprep.subr.bf16.mxu0 %v2433_v60 }
 0x523   : > { %2386 = vmatpush3.bf16.msra.mxu0 %v2433_v60  ;;  %v2445_v60 = vld [vmem:[%s3092_s9 + $0x30] ss:$8 sps:$4 sm:$0xff]  }
 0x524   : > { %2387 = vmatprep.subr.bf16.mxu0 %v2434_v62 }
 0x527   : > { %2388 = vmatpush3.bf16.msra.mxu0 %v2434_v62  ;;  %v2447_v62 = vld [vmem:[%s3092_s9 + $0x34] ss:$8 sps:$4 sm:$0xff]  }
 0x528   : > { %2389 = vmatprep.subr.bf16.mxu0 %v2435_v8 }
 0x52b   : > { %2390 = vmatpush3.bf16.msra.mxu0 %v2435_v8 }
 0x5b0   : > { %v2357_v30 = vpop.f32.mrb[16].mxu1 }
 0x5b1   : > { %1515 = vst.msk [vmem:[#allocation4 + $0x10] sm:$0x1] %vm641_vm3, %v2357_v30  ;;  %v1328_v10 = vpop.f32.mrb[17].mxu1 }
 0x5b2   : > { %1513 = vst.msk [vmem:[#allocation4] sm:$0xff] %vm638_vm2, %v1328_v10  ;;  %v2358_v45 = vpop.f32.mrb[18].mxu1 }
 0x5b3   : > { %v1331_v16 = vpop.f32.mrb[19].mxu1 }
 0x5b4   : > { %1514 = vst.msk [vmem:[#allocation4 + $0x8] sm:$0xff] %vm638_vm2, %v1331_v16  ;;  %v2438_v16 = vld [vmem:[%s3092_s9 + $0x4] ss:$8 sps:$4 sm:$0xff]  }
 0x5b5   : > { %1798 = vmatprep.subr.bf16.mxu1 %v2438_v16 }
 0x5e2   : > { %v2365_v50 = vpop.f32.mrb[20].mxu1 }
 0x5e3   : > { %1523 = vrot.lane.b32.xlu0 %v2365_v50, %s2549_s29  ;;  %v1385_v51 = vpop.f32.mrb[21].mxu1  ;;  %v2436_v50 = vld [vmem:[%s3092_s9] ss:$8 sps:$4 sm:$0xff]  }
 0x5e4   : > { %v2366_v53 = vpop.f32.mrb[22].mxu1  ;;  %1799 = vmatpush1.bf16.msra.mxu1 %v2436_v50 }
 0x5e5   : > { %v1388_v54 = vpop.f32.mrb[23].mxu1  ;;  %v2439_v53 = vld [vmem:[%s3092_s9 + $0x10] ss:$8 sps:$4 sm:$0xff]  }
 0x5e6   : > { %1521 = vrot.lane.b32.xlu1 %v1388_v54, %s2549_s29  ;;  %v2444_v54 = vld [vmem:[%s3092_s9 + $0x24] ss:$8 sps:$4 sm:$0xff]  }
 0x5e7   : > { %1519 = vrot.lane.b32.xlu0 %v1385_v51, %s2549_s29  ;;  %v2441_v51 = vld [vmem:[%s3092_s9 + $0x14] ss:$8 sps:$4 sm:$0xff]  }
 0x5e8   : > { %1800 = vmatprep.subr.bf16.mxu1 %v2441_v51 }
 0x5e9   : > { %1801 = vmatpush1.bf16.msra.mxu1 %v2439_v53 }
 0x5ea   : > { %1802 = vmatprep.subr.bf16.mxu1 %v2444_v54 }
 0x5ed   : > { %1803 = vmatpush1.bf16.msra.mxu1 %v2442_v55 }
 0x5ee   : > { %1804 = vmatprep.subr.bf16.mxu1 %v2447_v62 }
 0x5f1   : > { %v2373_v63 = vpop.f32.mrb[8].mxu0  ;;  %1805 = vmatpush1.bf16.msra.mxu1 %v2445_v60 }
 0x5f2   : > { %v2381_v1 = vpop.f32.mrb[24].mxu1  ;;  %1540 = vrot.lane.b32.xlu1 %v2373_v63, %s2547_s24  ;;  %v1442_v5 = vpop.f32.mrb[9].mxu0 }
 0x5f3   : > { %v2374_v9 = vpop.f32.mrb[10].mxu0  ;;  %v1499_v13 = vpop.f32.mrb[25].mxu1 }
 0x5f4   : > { %1553 = vrot.lane.b32.xlu0 %v1499_v13, %s2545_s22  ;;  %v1445_v15 = vpop.f32.mrb[11].mxu0  ;;  %v2382_v40 = vpop.f32.mrb[26].mxu1 }
 0x5f5   : > { %v1502_v44 = vpop.f32.mrb[27].mxu1 }
 0x5f6   : > { %1536 = vrot.lane.b32.xlu1 %v1442_v5, %s2547_s24 }
 0x5f8   : > { %1538 = vrot.lane.b32.xlu0 %v1445_v15, %s2547_s24 }
 0x5fa   : > { %1555 = vrot.lane.b32.xlu1 %v1502_v44, %s2545_s22 }
 0x5fc   : > { %1557 = vrot.lane.b32.xlu0 %v2381_v1, %s2545_s22 }
 0x655   : > { %v1524_v57 = vpop.permute.xlu0 %1523 }
 0x656   : > { %1532 = vst.msk [vmem:[#allocation4 + $0x10] sm:$0x1] %vm1531_vm7, %v1524_v57 }
 0x658   : > { %v1522_v17 = vpop.permute.xlu1 %1521 }
 0x659   : > { %1530 = vst.msk [vmem:[#allocation4 + $0x8] sm:$0xff] %vm1528_vm8, %v1522_v17  ;;  %v1520_v18 = vpop.permute.xlu0 %1519  ;;  %v2212_v17 = vld [vmem:[%s3090_s7] ss:$0 sm:$0xff] }
 0x65a   : > { %1529 = vst.msk [vmem:[#allocation4] sm:$0xff] %vm1528_vm8, %v1520_v18 }
 0x664   : > { %v1541_v19 = vpop.permute.xlu1 %1540 }
 0x665   : > { %1549 = vst.msk [vmem:[#allocation4 + $0x10] sm:$0x1] %vm1548_vm9, %v1541_v19 }
 0x666   : > { %v1554_v21 = vpop.permute.xlu0 %1553 }
 0x668   : > { %v1537_v22 = vpop.permute.xlu1 %1536 }
 0x669   : > { %1546 = vst.msk [vmem:[#allocation4] sm:$0xff] %vm1545_vm10, %v1537_v22 }
 0x66a   : > { %1563 = vst.msk [vmem:[#allocation4] sm:$0xff] %vm1562_vm11, %v1554_v21  ;;  %v1539_v56 = vpop.permute.xlu0 %1538 }
 0x66b   : > { %1547 = vst.msk [vmem:[#allocation4 + $0x8] sm:$0xff] %vm1545_vm10, %v1539_v56  ;;  %v2213_v56 = vld [vmem:[%s3091_s8] ss:$0 sm:$0xff] }
 0x66c   : > { %v1556_v23 = vpop.permute.xlu1 %1555 }
 0x66d   : > { %1564 = vst.msk [vmem:[#allocation4 + $0x8] sm:$0xff] %vm1562_vm11, %v1556_v23 }
 0x66e   : > { %v1558_v0 = vpop.permute.xlu0 %1557 }
 0x66f   : > { %1566 = vst.msk [vmem:[#allocation4 + $0x10] sm:$0x1] %vm1565_vm12, %v1558_v0 }
 0x671   : > { %v1567_v24 = vld [vmem:[#allocation4] sm:$0xff] }
 0x674   : > { %v1568_v11 = vld [vmem:[#allocation4 + $0x8] sm:$0xff] }
 0x675   : > { %v1570_v25 = vpack.c.bf16 %v1568_v11, %v1567_v24 }
 0x676   : > { %v1569_v6 = vld [vmem:[#allocation4 + $0x10] sm:$0x1] }
 0x677   : > { %2391 = vmatprep.mubr.msk.bf16.mxu0 %vm450_vm0, %v1570_v25  ;;  %v1571_v26 = vpack.c.bf16 %v1569_v6, %v1569_v6 }
 0x679   : > { %2392 = vmatmul.mubr.msk.bf16.vlgmr.msra.gmra.mrb[12].mxu0 %vm450_vm0, %v1571_v26 }
 0x74c   : > { %v2393_v28 = vpop.f32.mrb[12].mxu0 }
 0x74d   : > { %v1644_v29 = vpop.f32.mrb[13].mxu0  ;;  %v1660_v7 = vadd.f32 %v2393_v28, %v2640_v3 }
 0x74e   : > { %v1658_v52 = vadd.f32 %v2638_v2, %v1644_v29  ;;  %v2394_v12 = vpop.f32.mrb[14].mxu0  ;;  %v2448_v29 = vld [vmem:[%s3094_s11 + $0x40] sm:$0xff]  }
 0x74f   : > { %v1647_v27 = vpop.f32.mrb[15].mxu0  ;;  %v2968_v37 = vadd.f32 %v2211_v46, %v1660_v7  ;;  %2291 = vmatprep.subr.bf16.mxu0 %v2448_v29  ;;  %v2450_v12 = vld [vmem:[%s3094_s11 + $0x48] sm:$0xff]   ;;  %v2453_v7 = vld [vmem:[%s3094_s11 + $0x10] sm:$0xff]  }
 0x750   : > { %v2961_v14 = vadd.f32 %v2211_v46, %v1658_v52  ;;  %v1659_v32 = vadd.f32 %v2642_v4, %v1647_v27  ;;  %v2449_v52 = vld [vmem:[%s3094_s11] sm:$0xff]   ;;  %v2452_v27 = vld [vmem:[%s3094_s11 + $0x50] sm:$0xff]  }
 0x751   : > { %v1679_v2 = vsel %vm457_vm1, %v2968_v37, 0.0  ;;  %2292 = vmatpush3.bf16.msra.mxu0 %v2449_v52 }
 0x752   : > { %v2964_v35 = vadd.f32 %v2211_v46, %v1659_v32  ;;  %v1673_v20 = vsel %vm450_vm0, %v2961_v14, 0.0  ;;  %2293 = vmatprep.subr.bf16.mxu0 %v2450_v12  ;;  %v2454_v32 = vld [vmem:[%s3094_s11 + $0x58] sm:$0xff]  }
 0x753   : > { %1674 = vadd.xlane.f32.xlu1 %v1673_v20  ;;  %v2455_v20 = vld [vmem:[%s3094_s11 + $0x18] sm:$0xff]  }
 0x754   : > { %v1676_v38 = vsel %vm450_vm0, %v2964_v35, 0.0 }
 0x755   : > { %1677 = vadd.xlane.f32.xlu0 %v1676_v38  ;;  %v2456_v38 = vld [vmem:[%s3094_s11 + $0x60] sm:$0xff]  }
 0x759   : > { %1680 = vadd.xlane.f32.xlu0 %v1679_v2  ;;  %v2457_v2 = vld [vmem:[%s3094_s11 + $0x20] sm:$0xff]  }
 0x7e0   : > { %v1675_v3 = vpop.xlane.xlu1 %1674 }
 0x7e1   : > { %v1682_v39 = vmul.f32 0.015625, %v1675_v3  ;;  %v2458_v3 = vld [vmem:[%s3094_s11 + $0x68] sm:$0xff]  }
 0x7e2   : > { %v1678_v41 = vpop.xlane.xlu0 %1677 }
 0x7e3   : > { %v1685_v4 = vsub.f32 %v2961_v14, %v1682_v39  ;;  %v1683_v42 = vmul.f32 0.015625, %v1678_v41  ;;  %v2459_v39 = vld [vmem:[%s3094_s11 + $0x28] sm:$0xff]   ;;  %v2460_v41 = vld [vmem:[%s3094_s11 + $0x70] sm:$0xff]  }
 0x7e5   : > { %v1686_v43 = vsub.f32 %v2964_v35, %v1683_v42  ;;  %v1688_v47 = vmul.f32 %v1685_v4, %v1685_v4  ;;  %v2462_v42 = vld [vmem:[%s3094_s11 + $0x78] sm:$0xff]  }
 0x7e6   : > { %v1681_v48 = vpop.xlane.xlu0 %1680 }
 0x7e7   : > { %v1684_v49 = vmul.f32 0.015625, %v1681_v48  ;;  %v1691_v34 = vsel %vm450_vm0, %v1688_v47, 0.0  ;;  %v1689_v33 = vmul.f32 %v1686_v43, %v1686_v43  ;;  %v1740_v47 = vld [vmem:[%s3093_s10] sm:$0x3] }
 0x7e8   : > { %1692 = vadd.xlane.f32.xlu0 %v1691_v34  ;;  %v1745_v48 = vrot.slane %v1740_v47, %v524_v59 }
 0x7e9   : > { %v1687_v36 = vsub.f32 %v2968_v37, %v1684_v49  ;;  %v1694_v30 = vsel %vm450_vm0, %v1689_v33, 0.0  ;;  %v1749_v49 = vrot.slane %v1740_v47, %v528_v61 }
 0x7ea   : > { %1695 = vadd.xlane.f32.xlu1 %v1694_v30 }
 0x7eb   : > { %v1690_v10 = vmul.f32 %v1687_v36, %v1687_v36 }
 0x7ed   : > { %v1697_v45 = vsel %vm457_vm1, %v1690_v10, 0.0 }
 0x7ee   : > { %1698 = vadd.xlane.f32.xlu0 %v1697_v45 }
 0x875   : > { %v1693_v63 = vpop.xlane.xlu0 %1692 }
 0x876   : > { %v1700_v1 = vmul.f32 0.015625, %v1693_v63 }
 0x877   : > { %v1696_v5 = vpop.xlane.xlu1 %1695 }
 0x878   : > { %v1703_v8 = vadd.f32 1e-06, %v1700_v1  ;;  %v1701_v9 = vmul.f32 0.015625, %v1696_v5 }
 0x87a   : > { %2518 = vrsqrt.f32 %v1703_v8  ;;  %v1704_v13 = vadd.f32 1e-06, %v1701_v9 }
 0x87b   : > { %v1699_v15 = vpop.xlane.xlu0 %1698 }
 0x87c   : > { %2520 = vrsqrt.f32 %v1704_v13  ;;  %v1702_v40 = vmul.f32 0.015625, %v1699_v15 }
 0x87e   : > { %v1705_v44 = vadd.f32 1e-06, %v1702_v40 }
 0x880   : > { %2522 = vrsqrt.f32 %v1705_v44 }
 0x884   : > { %v2519_v57 = vpop.eup %2518 }
 0x885   : > { %v1709_v18 = vmul.f32 %v2519_v57, %v1685_v4  ;;  %v2461_v4 = vld [vmem:[%s3094_s11 + $0x30] sm:$0xff]  }
 0x886   : > { %v2521_v19 = vpop.eup %2520 }
 0x887   : > { %v1718_v21 = vmul.f32 %v2212_v17, %v1709_v18  ;;  %v1710_v22 = vmul.f32 %v2521_v19, %v1686_v43  ;;  %v2463_v43 = vld [vmem:[%s3094_s11 + $0x38] sm:$0xff]  }
 0x889   : > { %v1719_v23 = vmul.f32 %v2212_v17, %v1710_v22  ;;  %v1727_v11 = vadd.f32 %v2213_v56, %v1718_v21 }
 0x88a   : > { %v2523_v0 = vpop.eup %2522 }
 0x88b   : > { %v1711_v24 = vmul.f32 %v2523_v0, %v1687_v36  ;;  %v1728_v25 = vadd.f32 %v2213_v56, %v1719_v23 }
 0x88d   : > { %v1730_v6 = vpack.c.bf16 %v1728_v25, %v1727_v11  ;;  %v1720_v26 = vmul.f32 %v2212_v17, %v1711_v24 }
 0x88f   : > { %2222 = vmatmul.mubr.msk.bf16.vlgmr.msra.gmra.mrb[28].mxu1 %vm450_vm0, %v1730_v6  ;;  %v1729_v28 = vadd.f32 %v2213_v56, %v1720_v26 }
 0x890   : > { %1840 = vmatprep.mubr.bf16.mxu1 %v2544_v31  ;;  %v2451_v31 = vld [vmem:[%s3094_s11 + $0x8] sm:$0xff]  }
 0x891   : > { %v1731_v46 = vpack.c.bf16 %v1729_v28, %v1729_v28  ;;  %2294 = vmatpush3.bf16.msra.mxu0 %v2451_v31 }
 0x892   : > { %2295 = vmatprep.subr.bf16.mxu0 %v2452_v27 }
 0x895   : > { %2296 = vmatpush3.bf16.msra.mxu0 %v2453_v7 }
 0x896   : > { %2297 = vmatprep.subr.bf16.mxu0 %v2454_v32 }
 0x897   : > { %2223 = vmatmul.mubr.msk.bf16.gmra.mrb[32].mxu1 %vm450_vm0, %v1731_v46 }
 0x899   : > { %2298 = vmatpush3.bf16.msra.mxu0 %v2455_v20 }
 0x89a   : > { %2299 = vmatprep.subr.bf16.mxu0 %v2456_v38 }
 0x89d   : > { %2300 = vmatpush3.bf16.msra.mxu0 %v2457_v2 }
 0x89e   : > { %2301 = vmatprep.subr.bf16.mxu0 %v2458_v3 }
 0x8a1   : > { %2302 = vmatpush3.bf16.msra.mxu0 %v2459_v39 }
 0x8a2   : > { %2303 = vmatprep.subr.bf16.mxu0 %v2460_v41 }
 0x8a5   : > { %2304 = vmatpush3.bf16.msra.mxu0 %v2461_v4 }
 0x8a6   : > { %2305 = vmatprep.subr.bf16.mxu0 %v2462_v42 }
 0x8a9   : > { %2306 = vmatpush3.bf16.msra.mxu0 %v2463_v43 }
 0x962   : > { %v1832_v34 = vpop.f32.mrb[28].mxu1 }
 0x963   : > { %v1833_v33 = vadd.f32 %v1832_v34, %v1745_v48  ;;  %v1834_v36 = vpop.f32.mrb[29].mxu1 }
 0x964   : > { %v1835_v30 = vadd.f32 %v1834_v36, %v1749_v49  ;;  %v1836_v10 = vpop.f32.mrb[30].mxu1 }
 0x965   : > { %v1855_v45 = vmul.f32 0.044715, %v1833_v33  ;;  %v1837_v16 = vadd.f32 %v1836_v10, %v1745_v48  ;;  %v1838_v50 = vpop.f32.mrb[31].mxu1  ;;  %v1849_v38 = vmul.f32 0.5, %v1833_v33 }
 0x966   : > { %v1856_v51 = vmul.f32 0.044715, %v1835_v30  ;;  %v1839_v53 = vadd.f32 %v1838_v50, %v1749_v49  ;;  %v1850_v39 = vmul.f32 0.5, %v1835_v30 }
 0x967   : > { %v1861_v54 = vmul.f32 %v1855_v45, %v1833_v33  ;;  %v1857_v55 = vmul.f32 0.044715, %v1837_v16  ;;  %v1851_v2 = vmul.f32 0.5, %v1837_v16 }
 0x968   : > { %v1862_v60 = vmul.f32 %v1856_v51, %v1835_v30  ;;  %v1858_v62 = vmul.f32 0.044715, %v1839_v53  ;;  %v1852_v41 = vmul.f32 0.5, %v1839_v53 }
 0x969   : > { %v1867_v63 = vmul.f32 %v1861_v54, %v1833_v33  ;;  %v1863_v1 = vmul.f32 %v1857_v55, %v1837_v16 }
 0x96a   : > { %v1868_v59 = vmul.f32 %v1862_v60, %v1835_v30  ;;  %v1864_v5 = vmul.f32 %v1858_v62, %v1839_v53  ;;  %v1842_v58 = vpop.f32.mrb[32].mxu1  ;;  %v2224_v60 = vld [vmem:[%s3095_s12] ss:$0 sm:$0xff] }
 0x96b   : > { %v1873_v61 = vadd.f32 %v1867_v63, %v1833_v33  ;;  %v1869_v8 = vmul.f32 %v1863_v1, %v1837_v16  ;;  %v1843_v9 = vadd.f32 %v1842_v58, %v1745_v48  ;;  %v1844_v13 = vpop.f32.mrb[33].mxu1 }
 0x96c   : > { %v1870_v15 = vmul.f32 %v1864_v5, %v1839_v53  ;;  %v1845_v40 = vadd.f32 %v1844_v13, %v1749_v49  ;;  %v1846_v44 = vpop.f32.mrb[34].mxu1  ;;  %v1874_v57 = vadd.f32 %v1868_v59, %v1835_v30 }
 0x96d   : > { %v1879_v17 = vmul.f32 0.7978846, %v1873_v61  ;;  %v1875_v18 = vadd.f32 %v1869_v8, %v1837_v16  ;;  %v1859_v19 = vmul.f32 0.044715, %v1843_v9  ;;  %v1847_v21 = vpop.f32.mrb[35].mxu1  ;;  %v1853_v54 = vmul.f32 0.5, %v1843_v9 }
 0x96e   : > { %v1860_v22 = vmul.f32 0.044715, %v1845_v40  ;;  %v1876_v56 = vadd.f32 %v1870_v15, %v1839_v53  ;;  %v1880_v23 = vmul.f32 0.7978846, %v1874_v57  ;;  %v1854_v50 = vmul.f32 0.5, %v1845_v40 }
 0x96f   : > { %2524 = vtanh.f32 %v1879_v17  ;;  %v1881_v0 = vmul.f32 0.7978846, %v1875_v18  ;;  %v1865_v24 = vmul.f32 %v1859_v19, %v1843_v9  ;;  %v2112_v21 = vld [vmem:[%s440_s30 + $0x8] sm:$0x1] }
 0x970   : > { %v1866_v11 = vmul.f32 %v1860_v22, %v1845_v40  ;;  %v1882_v25 = vmul.f32 0.7978846, %v1876_v56  ;;  %2526 = vtanh.f32 %v1880_v23 }
 0x971   : > { %2528 = vtanh.f32 %v1881_v0  ;;  %v1871_v6 = vmul.f32 %v1865_v24, %v1843_v9 }
 0x972   : > { %2530 = vtanh.f32 %v1882_v25  ;;  %v1872_v26 = vmul.f32 %v1866_v11, %v1845_v40 }
 0x973   : > { %v1877_v28 = vadd.f32 %v1871_v6, %v1843_v9 }
 0x974   : > { %v1878_v46 = vadd.f32 %v1872_v26, %v1845_v40 }
 0x975   : > { %v1883_v29 = vmul.f32 0.7978846, %v1877_v28 }
 0x976   : > { %v1884_v52 = vmul.f32 0.7978846, %v1878_v46 }
 0x977   : > { %2532 = vtanh.f32 %v1883_v29 }
 0x978   : > { %2534 = vtanh.f32 %v1884_v52 }
 0x979   : > { %v2525_v12 = vpop.eup %2524 }
 0x97a   : > { %v2527_v31 = vpop.eup %2526  ;;  %v1891_v27 = vadd.f32 1.0, %v2525_v12 }
 0x97b   : > { %v2529_v7 = vpop.eup %2528  ;;  %v1892_v32 = vadd.f32 1.0, %v2527_v31 }
 0x97c   : > { %v2531_v20 = vpop.eup %2530  ;;  %v1893_v3 = vadd.f32 1.0, %v2529_v7  ;;  %v1897_v42 = vmul.f32 %v1891_v27, %v1849_v38 }
 0x97d   : > { %v1894_v4 = vadd.f32 1.0, %v2531_v20  ;;  %v1898_v47 = vmul.f32 %v1892_v32, %v1850_v39 }
 0x97e   : > { %v1899_v43 = vmul.f32 %v1893_v3, %v1851_v2 }
 0x97f   : > { %v1900_v48 = vmul.f32 %v1894_v4, %v1852_v41 }
 0x980   : > { %v1903_v49 = vpack.c.bf16 %v1899_v43, %v1897_v42 }
 0x981   : > { %v2533_v34 = vpop.eup %2532  ;;  %v1904_v36 = vpack.c.bf16 %v1900_v48, %v1898_v47 }
 0x982   : > { %v2535_v10 = vpop.eup %2534  ;;  %v1895_v45 = vadd.f32 1.0, %v2533_v34 }
 0x983   : > { %2074 = vmatprep.mubr.bf16.mxu0 %v1904_v36  ;;  %v1896_v51 = vadd.f32 1.0, %v2535_v10 }
 0x984   : > { %2075 = vmatmul.mubr.bf16.vlgmr.msra.gmra.mrb[16].mxu0 %v1903_v49  ;;  %v1901_v16 = vmul.f32 %v1895_v45, %v1853_v54 }
 0x985   : > { %v1902_v33 = vmul.f32 %v1896_v51, %v1854_v50 }
 0x986   : > { %v1905_v53 = vpack.c.bf16 %v1901_v16, %v1901_v16 }
 0x987   : > { %v1906_v30 = vpack.c.bf16 %v1902_v33, %v1902_v33 }
 0x989   : > { %2082 = vmatprep.mubr.bf16.mxu0 %v1906_v30 }
 0x98c   : > { %2083 = vmatmul.mubr.bf16.gmra.mrb[20].mxu0 %v1905_v53 }
 0xa57   : > { %v2307_v55 = vpop.f32.mrb[16].mxu0 }
 0xa58   : > { %v2308_v62 = vpop.f32.mrb[17].mxu0 }
 0xa59   : > { %v2309_v63 = vadd.f32 %v2308_v62, %v2307_v55  ;;  %v2310_v1 = vpop.f32.mrb[18].mxu0 }
 0xa5a   : > { %v2311_v59 = vpop.f32.mrb[19].mxu0 }
 0xa5b   : > { %v2077_v5 = vadd.f32 %v2309_v63, %v2224_v60  ;;  %v2312_v58 = vadd.f32 %v2311_v59, %v2310_v1 }
 0xa5d   : > { %v2090_v61 = vadd.f32 %v2077_v5, %v2961_v14  ;;  %v2080_v8 = vadd.f32 %v2312_v58, %v2224_v60 }
 0xa5f   : > { %v2246_v9 = vpack.c.bf16 %v2090_v61, %v2090_v61  ;;  %v2091_v13 = vadd.f32 %v2080_v8, %v2964_v35  ;;  %v2313_v15 = vpop.f32.mrb[20].mxu0 }
 0xa60   : > { %v2314_v40 = vpop.f32.mrb[21].mxu0 }
 0xa61   : > { %2107 = vst.msk [vmem:[%s440_s30] sm:$0xf] %vm2106_vm13, %v2246_v9  ;;  %v2247_v44 = vpack.c.bf16 %v2091_v13, %v2091_v13  ;;  %v2315_v57 = vadd.f32 %v2314_v40, %v2313_v15  ;;  %v2316_v17 = vpop.f32.mrb[22].mxu0 }
 0xa62   : > { %v2317_v18 = vpop.f32.mrb[23].mxu0 }
 0xa63   : > { %2108 = vst.msk [vmem:[%s440_s30 + $0x4] sm:$0xf] %vm2106_vm13, %v2247_v44  ;;  %v2085_v19 = vadd.f32 %v2315_v57, %v2224_v60 }
 0xa65   : > { %v2092_v14 = vadd.f32 %v2085_v19, %v2968_v37 }
 0xa67   : > { %v2248_v22 = vpack.c.bf16 %v2092_v14, %v2092_v14 }
 0xa69   : > { %v2113_v56 = vsel %vm2111_vm15, %v2248_v22, %v2112_v21 }
 0xa6a   : > { %2114 = vst [vmem:[%s440_s30 + $0x8] sm:$0x1] %v2113_v56 }
 0xa6b PF: > { %s23_s25 = sadd.s32 1, %s2542_s25  }
 0xa6c   : > { %p20_p4 = scmp.ge.s32.totalorder %s23_s25, 4  }
 0xa6e   :  { %22 = sbr.rel (!%p20_p4) target bundleno = 1 (0x1), region = 113 }

</bundles_post_ra>
